<compile_context>
chip_gen: v7x
topology: tpu7x:2x2x1
jax: 0.10.0
libtpu: 0.0.40
codegen_flags: <defaults>
</compile_context>

<pallas_src>
import numpy as np
import jax
import jax.numpy as jnp
from jax.experimental import pallas as pl
from jax.experimental.pallas import tpu as pltpu

# MXU input dtype: bf16 inputs + f32 accumulation hit the native bf16 MXU path on v6e/v7x
# (and are fine on v5e).  Set to jnp.float32 to force full-f32 matmuls.
MXU_DTYPE = jnp.bfloat16


def _dot(a, b):
    return jnp.dot(a.astype(MXU_DTYPE), b.astype(MXU_DTYPE),
                   preferred_element_type=jnp.float32)


# ------------------------ fused encoder kernel ------------------------
def encoder_kernel(adj_ref, x_ref, ef_ref, noise_ref, pmat_ref, mask_ref,
                   we1, be1, we2, be2,
                   wn1, bn1, wn2, bn2,
                   wb, wc, bc,
                   wmv1, bmv1, wmv2, bmv2,
                   out_ref):
    M = x_ref.shape[0]               # folded rows in this chunk (= graphs_in_chunk * N)
    N = ef_ref.shape[0] // M         # nodes per graph
    H = wn2.shape[1]                 # hidden_dim
    L = wb.shape[0]                  # message-passing layers
    Z = wmv2.shape[1] // 2           # z_dim

    # ---- edge MLP over all folded edges ----
    eh = jnp.tanh(_dot(ef_ref[...], we1[...]) + be1[...])            # (M*N, 128)
    eh = jnp.tanh(_dot(eh, we2[...]) + be2[...])                     # (M*N, H)
    # einsum('bijc,bjk->bik', edge_hidden, h) == blockdiag(sum_c edge_hidden) @ h_folded
    eh_sum = jnp.sum(eh.reshape(M, N, H), axis=-1)                   # (M, N)
    # place per-graph (N,N) blocks on the diagonal of an (M,M) matrix:
    # (eh_sum @ pmat) replicates the N columns across graph blocks, mask zeroes the
    # off-diagonal blocks.  MXU + VPU only, no lane concat / gather.
    esum_bd = _dot(eh_sum, pmat_ref[...]) * mask_ref[...]            # (M, M)

    # ---- node MLP ----
    nh = jnp.tanh(_dot(x_ref[...], wn1[...]) + bn1[...])             # (M, 128)
    nh = jnp.tanh(_dot(nh, wn2[...]) + bn2[...])                     # (M, H)

    adj = adj_ref[...]                                               # (M, M) block-diagonal
    wmv1_all = wmv1[...]                                             # ((L+1)*H, 256)

    # fused mean/logvar head: accumulate hcat @ [wm1 | wv1] layer by layer
    hidden = nh
    mv_pre = _dot(hidden, wmv1_all[:H, :])                           # (M, 256)

    for l in range(L):
        # GraphConvSparse: tanh(adj @ (hidden @ W)) -- one block-diag MXU op per layer
        zw = _dot(hidden, wb[l])                                     # (M, H)
        h = jnp.tanh(_dot(adj, zw))                                  # (M, H)
        # edge message: tanh(esum @ h)
        msg = jnp.tanh(_dot(esum_bd, h))                             # (M, H)
        # combine without lane concat: cat(h, msg) @ Wc == h @ Wc[:H] + msg @ Wc[H:]
        wcl = wc[l]                                                  # (2H, H)
        hidden = jnp.tanh(_dot(h, wcl[:H, :]) + _dot(msg, wcl[H:, :]) + bc[l])
        lo = (l + 1) * H
        mv_pre = mv_pre + _dot(hidden, wmv1_all[lo:lo + H, :])

    # one (M,256)@(256,2Z) matmul against blockdiag(wm2, wv2) -> [mean | logvar]
    mv = _dot(jnp.tanh(mv_pre + bmv1[...]), wmv2[...]) + bmv2[...]   # (M, 2Z)
    mean = mv[:, :Z]
    logvar = mv[:, Z:]
    latent = noise_ref[...] * jnp.exp(0.5 * logvar) + mean

    # lane-slice writes into the 128-lane-multiple output slab (no concatenate)
    out_ref[:, 0:Z] = latent
    out_ref[:, Z:2 * Z] = mean
    out_ref[:, 2 * Z:3 * Z] = logvar
    if out_ref.shape[1] > 3 * Z:                                     # zero dead pad lanes
        out_ref[:, 3 * Z:] = jnp.zeros((M, out_ref.shape[1] - 3 * Z), jnp.float32)


# ------------------------ wrapper ------------------------
def _round_up(x, m):
    return (x + m - 1) // m * m


def _chunk_size(B, N, target_rows=256, max_edge_rows=8192):
    """Graphs per grid step.  Fold as many graphs as possible into the MXU M dim:
    aim for C*N >= target_rows (128 on v5e, 256 on v6e/v7x) and a SINGLE grid step when
    the whole batch is below target, capped so the folded edge block (C*N*N rows of
    128-lane hidden state) stays comfortably inside the scoped VMEM limit."""
    divisors = [c for c in range(1, B + 1) if B % c == 0]
    feasible = [c for c in divisors if c * N * N <= max_edge_rows] or [1]
    for c in feasible:
        if c * N >= target_rows:
            return c
    return feasible[-1]


def graph_encoder_forward(adj, node_feat, edge_feat, noise, p,
                          batch_chunk=None, target_rows=256):
    B, N, _ = adj.shape
    Dn = node_feat.shape[-1]
    De = edge_feat.shape[-1]
    H = p["wn2"].shape[1]
    L = p["wb"].shape[0]
    Z = p["wm2"].shape[1]

    C = _chunk_size(B, N, target_rows) if batch_chunk is None else batch_chunk
    assert B % C == 0, "batch size must be divisible by the batch chunk"
    n_chunks = B // C
    M = C * N
    out_lanes = _round_up(3 * Z, 128)
    wdt = MXU_DTYPE                     # weight storage dtype (halves weight DMA / VMEM)

    # ---- layout-only glue (XLA side, cheap) ----
    x2 = node_feat.reshape(B * N, Dn)
    ef2 = edge_feat.reshape(B * N * N, De)
    nz2 = noise.reshape(B * N, Z)

    # block-diagonal adjacency per chunk: each message-passing layer becomes a single
    # (M,M)@(M,H) MXU op instead of C serialized per-graph matmuls.
    eye_c = jnp.eye(C, dtype=adj.dtype)
    adj_bd = jnp.einsum('gcij,cd->gcidj', adj.reshape(n_chunks, C, N, N),
                        eye_c).reshape(n_chunks * M, M)

    # constants used to block-diagonalize the in-kernel edge sums
    pmat = jnp.tile(jnp.eye(N, dtype=jnp.float32), (1, C))               # (N, M)
    blk = jnp.repeat(jnp.arange(C), N)
    bd_mask = (blk[:, None] == blk[None, :]).astype(jnp.float32)         # (M, M)

    # fused mean/logvar head weights: hcat @ [wm1|wv1] then blockdiag(wm2, wv2)
    wmv1 = jnp.concatenate([p["wm1"], p["wv1"]], axis=1)                 # ((L+1)H, 256)
    bmv1 = jnp.concatenate([p["bm1"], p["bv1"]], axis=1)                 # (1, 256)
    K = p["wm2"].shape[0]
    zk = jnp.zeros((K, Z), p["wm2"].dtype)
    wmv2 = jnp.concatenate(
        [jnp.concatenate([p["wm2"], zk], axis=1),
         jnp.concatenate([zk, p["wv2"]], axis=1)], axis=0)               # (2K, 2Z)
    bmv2 = jnp.concatenate([p["bm2"], p["bv2"]], axis=1)                 # (1, 2Z)

    weights = (p["we1"].astype(wdt), p["be1"], p["we2"].astype(wdt), p["be2"],
               p["wn1"].astype(wdt), p["bn1"], p["wn2"].astype(wdt), p["bn2"],
               p["wb"].astype(wdt), p["wc"].astype(wdt), p["bc"],
               wmv1.astype(wdt), bmv1, wmv2.astype(wdt), bmv2)

    def _chunk_spec(shape, block0):
        nd = len(shape)
        blk_shape = (block0,) + tuple(shape[1:])
        return pl.BlockSpec(blk_shape, lambda g, _nd=nd: (g,) + (0,) * (_nd - 1))

    def _full_spec(arr):
        nd = arr.ndim
        return pl.BlockSpec(arr.shape, lambda g, _nd=nd: (0,) * _nd)

    # advisory cost estimate so XLA schedules around the fused kernel sensibly
    flops = 2 * (B * N * N * (De * 128 + 128 * H)
                 + B * N * (Dn * 128 + 128 * H)
                 + B * N * M * N
                 + L * B * N * (3 * H * H + 2 * M * H + 256 * H)
                 + B * N * 256 * H
                 + B * N * 256 * 2 * Z)
    transcendentals = (B * N * N * (128 + H) + B * N * (128 + H)
                       + L * B * N * 3 * H + B * N * 256 + B * N * Z)
    data_in = (adj_bd, x2, ef2, nz2, pmat, bd_mask) + weights
    bytes_accessed = int(sum(int(a.size) * a.dtype.itemsize for a in data_in)
                         + B * N * out_lanes * 4)

    out = pl.pallas_call(
        encoder_kernel,
        out_shape=jax.ShapeDtypeStruct((B * N, out_lanes), jnp.float32),
        grid=(n_chunks,),
        in_specs=[_chunk_spec(adj_bd.shape, M),
                  _chunk_spec(x2.shape, M),
                  _chunk_spec(ef2.shape, C * N * N),
                  _chunk_spec(nz2.shape, M),
                  _full_spec(pmat),
                  _full_spec(bd_mask)]
                 + [_full_spec(w) for w in weights],
        out_specs=_chunk_spec((B * N, out_lanes), M),
        # chunks are independent; "arbitrary" vs "parallel" is measured neutral on v6e and
        # the default heuristic gives a single grid step anyway at these sizes.
        compiler_params=pltpu.CompilerParams(dimension_semantics=("arbitrary",)),
        cost_estimate=pl.CostEstimate(flops=int(flops),
                                      transcendentals=int(transcendentals),
                                      bytes_accessed=bytes_accessed),
    )(adj_bd, x2, ef2, nz2, pmat, bd_mask, *weights)

    latent = out[:, :Z].reshape(B, N, Z)
    mean = out[:, Z:2 * Z].reshape(B, N, Z)
    logvar = out[:, 2 * Z:3 * Z].reshape(B, N, Z)
    return latent, mean, logvar


# ------------------------ deterministic parameter init ------------------------
def init_params(key, num_layers, node_dim, edge_dim, hidden_dim, z_dim):
    keys = iter(jax.random.split(key, 32))

    def u(shape, scale=0.1):
        return jax.random.uniform(next(keys), shape, jnp.float32, -scale, scale)

    def glorot(in_d, out_d):
        r = float(np.sqrt(6.0 / (in_d + out_d)))
        return jax.random.uniform(next(keys), (in_d, out_d), jnp.float32, -r, r)

    p = {}
    p["wn1"], p["bn1"] = u((node_dim, 128)), u((1, 128))
    p["wn2"], p["bn2"] = u((128, hidden_dim)), u((1, hidden_dim))
    p["we1"], p["be1"] = u((edge_dim, 128)), u((1, 128))
    p["we2"], p["be2"] = u((128, hidden_dim)), u((1, hidden_dim))
    p["wb"] = jnp.stack([glorot(hidden_dim, hidden_dim) for _ in range(num_layers)])
    p["wc"] = u((num_layers, 2 * hidden_dim, hidden_dim))
    p["bc"] = u((num_layers, 1, hidden_dim))
    p["wm1"], p["bm1"] = u(((num_layers + 1) * hidden_dim, 128)), u((1, 128))
    p["wm2"], p["bm2"] = u((128, z_dim)), u((1, z_dim))
    p["wv1"], p["bv1"] = u(((num_layers + 1) * hidden_dim, 128)), u((1, 128))
    p["wv2"], p["bv2"] = u((128, z_dim)), u((1, z_dim))
    return p


# ------------------------ pure-JAX reference ------------------------
def reference_forward(adj, node_feat, edge_feat, noise, p):
    tanh = jnp.tanh
    nh = tanh(node_feat @ p["wn1"] + p["bn1"][0])
    nh = tanh(nh @ p["wn2"] + p["bn2"][0])
    eh = tanh(edge_feat @ p["we1"] + p["be1"][0])
    eh = tanh(eh @ p["we2"] + p["be2"][0])
    hidden = nh
    all_h = [nh]
    for l in range(p["wb"].shape[0]):
        h = tanh(jnp.einsum('bij,bjk->bik', adj, hidden @ p["wb"][l]))
        msg = tanh(jnp.einsum('bijc,bjk->bik', eh, h))
        hidden = tanh(jnp.concatenate([h, msg], -1) @ p["wc"][l] + p["bc"][l, 0])
        all_h.append(hidden)
    hcat = jnp.concatenate(all_h, -1)
    mean = tanh(hcat @ p["wm1"] + p["bm1"][0]) @ p["wm2"] + p["bm2"][0]
    logvar = tanh(hcat @ p["wv1"] + p["bv1"][0]) @ p["wv2"] + p["bv2"][0]
    latent = noise * jnp.exp(0.5 * logvar) + mean
    return latent, mean, logvar


if __name__ == "__main__":
    B, N = 4, 8
    node_dim, edge_dim, hidden_dim, z_dim, num_layers = 4, 4, 32, 32, 3

    key = jax.random.PRNGKey(0)
    k1, k2, k3, k4, kp = jax.random.split(key, 5)
    adj = jax.random.uniform(k1, (B, N, N), jnp.float32)
    adj = adj + jnp.transpose(adj, (0, 2, 1))
    node_feat = jax.random.normal(k2, (B, N, node_dim), jnp.float32)
    edge_feat = jax.random.normal(k3, (B, N, N, edge_dim), jnp.float32)
    # TODO(synk): torch.randn inside forward has no in-kernel equivalent with matching RNG;
    # the gaussian noise is generated here deterministically and fed to the kernel.
    noise = jax.random.normal(k4, (B, N, z_dim), jnp.float32)
    params = init_params(kp, num_layers, node_dim, edge_dim, hidden_dim, z_dim)

    latent, mean, logvar = graph_encoder_forward(adj, node_feat, edge_feat, noise, params)
    jax.block_until_ready((latent, mean, logvar))

    ref_lat, ref_mean, ref_lv = reference_forward(adj, node_feat, edge_feat, noise, params)
    # Tolerance covers bf16 MXU inputs (f32 accumulation) in the kernel vs XLA's default
    # f32 dot path; observed deltas are O(1e-3) at these magnitudes, a real semantic bug
    # would be orders larger.
    tol = dict(atol=2e-2, rtol=2e-2)
    np.testing.assert_allclose(np.asarray(mean), np.asarray(ref_mean), **tol)
    np.testing.assert_allclose(np.asarray(logvar), np.asarray(ref_lv), **tol)
    np.testing.assert_allclose(np.asarray(latent), np.asarray(ref_lat), **tol)
    print("KERNEL_OK")
</pallas_src>

<mosaic_0001>
module attributes {stable_mosaic.version = 11 : i64} {
  func.func @encoder_kernel(%arg0: i32, %arg1: memref<32x32xf32, #tpu.memory_space<vmem>>, %arg2: memref<32x4xf32, #tpu.memory_space<vmem>>, %arg3: memref<256x4xf32, #tpu.memory_space<vmem>>, %arg4: memref<32x32xf32, #tpu.memory_space<vmem>>, %arg5: memref<8x32xf32, #tpu.memory_space<vmem>>, %arg6: memref<32x32xf32, #tpu.memory_space<vmem>>, %arg7: memref<4x128xbf16, #tpu.memory_space<vmem>>, %arg8: memref<1x128xf32, #tpu.memory_space<vmem>>, %arg9: memref<128x32xbf16, #tpu.memory_space<vmem>>, %arg10: memref<1x32xf32, #tpu.memory_space<vmem>>, %arg11: memref<4x128xbf16, #tpu.memory_space<vmem>>, %arg12: memref<1x128xf32, #tpu.memory_space<vmem>>, %arg13: memref<128x32xbf16, #tpu.memory_space<vmem>>, %arg14: memref<1x32xf32, #tpu.memory_space<vmem>>, %arg15: memref<3x32x32xbf16, #tpu.memory_space<vmem>>, %arg16: memref<3x64x32xbf16, #tpu.memory_space<vmem>>, %arg17: memref<3x1x32xf32, #tpu.memory_space<vmem>>, %arg18: memref<128x256xbf16, #tpu.memory_space<vmem>>, %arg19: memref<1x256xf32, #tpu.memory_space<vmem>>, %arg20: memref<256x64xbf16, #tpu.memory_space<vmem>>, %arg21: memref<1x64xf32, #tpu.memory_space<vmem>>, %arg22: memref<32x128xf32, #tpu.memory_space<vmem>>) attributes {dimension_semantics = [#tpu.dimension_semantics<arbitrary>], iteration_bounds = array<i64: 1>, scalar_prefetch = 0 : i64, scratch_operands = 0 : i64, tpu.core_type = #tpu.core_type<tc>, window_params = [{transform_indices = @transform_0, window_bounds = array<i64: 32, 32>}, {transform_indices = @transform_1, window_bounds = array<i64: 32, 4>}, {transform_indices = @transform_2, window_bounds = array<i64: 256, 4>}, {transform_indices = @transform_3, window_bounds = array<i64: 32, 32>}, {pipeline_mode = #tpu.pipeline_mode<synchronous>, transform_indices = @transform_4, window_bounds = array<i64: 8, 32>}, {pipeline_mode = #tpu.pipeline_mode<synchronous>, transform_indices = @transform_5, window_bounds = array<i64: 32, 32>}, {pipeline_mode = #tpu.pipeline_mode<synchronous>, transform_indices = @transform_6, window_bounds = array<i64: 4, 128>}, {pipeline_mode = #tpu.pipeline_mode<synchronous>, transform_indices = @transform_7, window_bounds = array<i64: 1, 128>}, {pipeline_mode = #tpu.pipeline_mode<synchronous>, transform_indices = @transform_8, window_bounds = array<i64: 128, 32>}, {pipeline_mode = #tpu.pipeline_mode<synchronous>, transform_indices = @transform_9, window_bounds = array<i64: 1, 32>}, {pipeline_mode = #tpu.pipeline_mode<synchronous>, transform_indices = @transform_10, window_bounds = array<i64: 4, 128>}, {pipeline_mode = #tpu.pipeline_mode<synchronous>, transform_indices = @transform_11, window_bounds = array<i64: 1, 128>}, {pipeline_mode = #tpu.pipeline_mode<synchronous>, transform_indices = @transform_12, window_bounds = array<i64: 128, 32>}, {pipeline_mode = #tpu.pipeline_mode<synchronous>, transform_indices = @transform_13, window_bounds = array<i64: 1, 32>}, {pipeline_mode = #tpu.pipeline_mode<synchronous>, transform_indices = @transform_14, window_bounds = array<i64: 3, 32, 32>}, {pipeline_mode = #tpu.pipeline_mode<synchronous>, transform_indices = @transform_15, window_bounds = array<i64: 3, 64, 32>}, {pipeline_mode = #tpu.pipeline_mode<synchronous>, transform_indices = @transform_16, window_bounds = array<i64: 3, 1, 32>}, {pipeline_mode = #tpu.pipeline_mode<synchronous>, transform_indices = @transform_17, window_bounds = array<i64: 128, 256>}, {pipeline_mode = #tpu.pipeline_mode<synchronous>, transform_indices = @transform_18, window_bounds = array<i64: 1, 256>}, {pipeline_mode = #tpu.pipeline_mode<synchronous>, transform_indices = @transform_19, window_bounds = array<i64: 256, 64>}, {pipeline_mode = #tpu.pipeline_mode<synchronous>, transform_indices = @transform_20, window_bounds = array<i64: 1, 64>}, {transform_indices = @transform_21, window_bounds = array<i64: 32, 128>}]} {
    %c0 = arith.constant 0 : index
    %c0_0 = arith.constant 0 : index
    %0 = vector.load %arg3[%c0, %c0_0] : memref<256x4xf32, #tpu.memory_space<vmem>>, vector<256x4xf32>
    %c0_1 = arith.constant 0 : index
    %c0_2 = arith.constant 0 : index
    %1 = vector.load %arg7[%c0_1, %c0_2] : memref<4x128xbf16, #tpu.memory_space<vmem>>, vector<4x128xbf16>
    %2 = arith.truncf %0 : vector<256x4xf32> to vector<256x4xbf16>
    %cst = arith.constant dense<0.000000e+00> : vector<256x128xf32>
    %3 = tpu.matmul %2, %1, %cst {dimension_numbers = #tpu.dot_dimension_numbers<[1], [0], [0], [1], [0, 0, 1, 1], [], []>} : vector<256x4xbf16>, vector<4x128xbf16>, vector<256x128xf32> -> vector<256x128xf32>
    %c0_3 = arith.constant 0 : index
    %c0_4 = arith.constant 0 : index
    %4 = vector.load %arg8[%c0_3, %c0_4] : memref<1x128xf32, #tpu.memory_space<vmem>>, vector<1x128xf32>
    %5 = vector.broadcast %4 : vector<1x128xf32> to vector<256x128xf32>
    %6 = arith.addf %3, %5 : vector<256x128xf32>
    %7 = math.tanh %6 : vector<256x128xf32>
    %c0_5 = arith.constant 0 : index
    %c0_6 = arith.constant 0 : index
    %8 = vector.load %arg9[%c0_5, %c0_6] : memref<128x32xbf16, #tpu.memory_space<vmem>>, vector<128x32xbf16>
    %9 = arith.truncf %7 : vector<256x128xf32> to vector<256x128xbf16>
    %cst_7 = arith.constant dense<0.000000e+00> : vector<256x32xf32>
    %10 = tpu.matmul %9, %8, %cst_7 {dimension_numbers = #tpu.dot_dimension_numbers<[1], [0], [0], [1], [0, 0, 1, 1], [], []>} : vector<256x128xbf16>, vector<128x32xbf16>, vector<256x32xf32> -> vector<256x32xf32>
    %c0_8 = arith.constant 0 : index
    %c0_9 = arith.constant 0 : index
    %11 = vector.load %arg10[%c0_8, %c0_9] : memref<1x32xf32, #tpu.memory_space<vmem>>, vector<1x32xf32>
    %12 = vector.broadcast %11 : vector<1x32xf32> to vector<256x32xf32>
    %13 = arith.addf %10, %12 : vector<256x32xf32>
    %14 = math.tanh %13 : vector<256x32xf32>
    %15 = vector.shape_cast %14 : vector<256x32xf32> to vector<32x8x32xf32>
    %cst_10 = arith.constant dense<0.000000e+00> : vector<32x8xf32>
    %16 = vector.multi_reduction <add>, %15, %cst_10 [2] : vector<32x8x32xf32> to vector<32x8xf32>
    %c0_11 = arith.constant 0 : index
    %c0_12 = arith.constant 0 : index
    %17 = vector.load %arg5[%c0_11, %c0_12] : memref<8x32xf32, #tpu.memory_space<vmem>>, vector<8x32xf32>
    %18 = arith.truncf %16 : vector<32x8xf32> to vector<32x8xbf16>
    %19 = arith.truncf %17 : vector<8x32xf32> to vector<8x32xbf16>
    %cst_13 = arith.constant dense<0.000000e+00> : vector<32x32xf32>
    %20 = tpu.matmul %18, %19, %cst_13 {dimension_numbers = #tpu.dot_dimension_numbers<[1], [0], [0], [1], [0, 0, 1, 1], [], []>} : vector<32x8xbf16>, vector<8x32xbf16>, vector<32x32xf32> -> vector<32x32xf32>
    %c0_14 = arith.constant 0 : index
    %c0_15 = arith.constant 0 : index
    %21 = vector.load %arg6[%c0_14, %c0_15] : memref<32x32xf32, #tpu.memory_space<vmem>>, vector<32x32xf32>
    %22 = arith.mulf %20, %21 : vector<32x32xf32>
    %c0_16 = arith.constant 0 : index
    %c0_17 = arith.constant 0 : index
    %23 = vector.load %arg2[%c0_16, %c0_17] : memref<32x4xf32, #tpu.memory_space<vmem>>, vector<32x4xf32>
    %c0_18 = arith.constant 0 : index
    %c0_19 = arith.constant 0 : index
    %24 = vector.load %arg11[%c0_18, %c0_19] : memref<4x128xbf16, #tpu.memory_space<vmem>>, vector<4x128xbf16>
    %25 = arith.truncf %23 : vector<32x4xf32> to vector<32x4xbf16>
    %cst_20 = arith.constant dense<0.000000e+00> : vector<32x128xf32>
    %26 = tpu.matmul %25, %24, %cst_20 {dimension_numbers = #tpu.dot_dimension_numbers<[1], [0], [0], [1], [0, 0, 1, 1], [], []>} : vector<32x4xbf16>, vector<4x128xbf16>, vector<32x128xf32> -> vector<32x128xf32>
    %c0_21 = arith.constant 0 : index
    %c0_22 = arith.constant 0 : index
    %27 = vector.load %arg12[%c0_21, %c0_22] : memref<1x128xf32, #tpu.memory_space<vmem>>, vector<1x128xf32>
    %28 = vector.broadcast %27 : vector<1x128xf32> to vector<32x128xf32>
    %29 = arith.addf %26, %28 : vector<32x128xf32>
    %30 = math.tanh %29 : vector<32x128xf32>
    %c0_23 = arith.constant 0 : index
    %c0_24 = arith.constant 0 : index
    %31 = vector.load %arg13[%c0_23, %c0_24] : memref<128x32xbf16, #tpu.memory_space<vmem>>, vector<128x32xbf16>
    %32 = arith.truncf %30 : vector<32x128xf32> to vector<32x128xbf16>
    %cst_25 = arith.constant dense<0.000000e+00> : vector<32x32xf32>
    %33 = tpu.matmul %32, %31, %cst_25 {dimension_numbers = #tpu.dot_dimension_numbers<[1], [0], [0], [1], [0, 0, 1, 1], [], []>} : vector<32x128xbf16>, vector<128x32xbf16>, vector<32x32xf32> -> vector<32x32xf32>
    %c0_26 = arith.constant 0 : index
    %c0_27 = arith.constant 0 : index
    %34 = vector.load %arg14[%c0_26, %c0_27] : memref<1x32xf32, #tpu.memory_space<vmem>>, vector<1x32xf32>
    %35 = vector.broadcast %34 : vector<1x32xf32> to vector<32x32xf32>
    %36 = arith.addf %33, %35 : vector<32x32xf32>
    %37 = math.tanh %36 : vector<32x32xf32>
    %c0_28 = arith.constant 0 : index
    %c0_29 = arith.constant 0 : index
    %38 = vector.load %arg1[%c0_28, %c0_29] : memref<32x32xf32, #tpu.memory_space<vmem>>, vector<32x32xf32>
    %c0_30 = arith.constant 0 : index
    %c0_31 = arith.constant 0 : index
    %39 = vector.load %arg18[%c0_30, %c0_31] : memref<128x256xbf16, #tpu.memory_space<vmem>>, vector<128x256xbf16>
    %40 = vector.extract_strided_slice %39 {offsets = [0, 0], sizes = [32, 256], strides = [1, 1]} : vector<128x256xbf16> to vector<32x256xbf16>
    %41 = arith.truncf %37 : vector<32x32xf32> to vector<32x32xbf16>
    %cst_32 = arith.constant dense<0.000000e+00> : vector<32x256xf32>
    %42 = tpu.matmul %41, %40, %cst_32 {dimension_numbers = #tpu.dot_dimension_numbers<[1], [0], [0], [1], [0, 0, 1, 1], [], []>} : vector<32x32xbf16>, vector<32x256xbf16>, vector<32x256xf32> -> vector<32x256xf32>
    %c0_33 = arith.constant 0 : index
    %c0_34 = arith.constant 0 : index
    %c0_35 = arith.constant 0 : index
    %43 = vector.load %arg15[%c0_33, %c0_34, %c0_35] : memref<3x32x32xbf16, #tpu.memory_space<vmem>>, vector<1x32x32xbf16>
    %44 = vector.shape_cast %43 : vector<1x32x32xbf16> to vector<32x32xbf16>
    %45 = arith.truncf %37 : vector<32x32xf32> to vector<32x32xbf16>
    %cst_36 = arith.constant dense<0.000000e+00> : vector<32x32xf32>
    %46 = tpu.matmul %45, %44, %cst_36 {dimension_numbers = #tpu.dot_dimension_numbers<[1], [0], [0], [1], [0, 0, 1, 1], [], []>} : vector<32x32xbf16>, vector<32x32xbf16>, vector<32x32xf32> -> vector<32x32xf32>
    %47 = arith.truncf %38 : vector<32x32xf32> to vector<32x32xbf16>
    %48 = arith.truncf %46 : vector<32x32xf32> to vector<32x32xbf16>
    %cst_37 = arith.constant dense<0.000000e+00> : vector<32x32xf32>
    %49 = tpu.matmul %47, %48, %cst_37 {dimension_numbers = #tpu.dot_dimension_numbers<[1], [0], [0], [1], [0, 0, 1, 1], [], []>} : vector<32x32xbf16>, vector<32x32xbf16>, vector<32x32xf32> -> vector<32x32xf32>
    %50 = math.tanh %49 : vector<32x32xf32>
    %51 = arith.truncf %22 : vector<32x32xf32> to vector<32x32xbf16>
    %52 = arith.truncf %50 : vector<32x32xf32> to vector<32x32xbf16>
    %cst_38 = arith.constant dense<0.000000e+00> : vector<32x32xf32>
    %53 = tpu.matmul %51, %52, %cst_38 {dimension_numbers = #tpu.dot_dimension_numbers<[1], [0], [0], [1], [0, 0, 1, 1], [], []>} : vector<32x32xbf16>, vector<32x32xbf16>, vector<32x32xf32> -> vector<32x32xf32>
    %54 = math.tanh %53 : vector<32x32xf32>
    %c0_39 = arith.constant 0 : index
    %c0_40 = arith.constant 0 : index
    %c0_41 = arith.constant 0 : index
    %55 = vector.load %arg16[%c0_39, %c0_40, %c0_41] : memref<3x64x32xbf16, #tpu.memory_space<vmem>>, vector<1x64x32xbf16>
    %56 = vector.shape_cast %55 : vector<1x64x32xbf16> to vector<64x32xbf16>
    %57 = vector.extract_strided_slice %56 {offsets = [0, 0], sizes = [32, 32], strides = [1, 1]} : vector<64x32xbf16> to vector<32x32xbf16>
    %58 = arith.truncf %50 : vector<32x32xf32> to vector<32x32xbf16>
    %cst_42 = arith.constant dense<0.000000e+00> : vector<32x32xf32>
    %59 = tpu.matmul %58, %57, %cst_42 {dimension_numbers = #tpu.dot_dimension_numbers<[1], [0], [0], [1], [0, 0, 1, 1], [], []>} : vector<32x32xbf16>, vector<32x32xbf16>, vector<32x32xf32> -> vector<32x32xf32>
    %60 = vector.extract_strided_slice %56 {offsets = [32, 0], sizes = [32, 32], strides = [1, 1]} : vector<64x32xbf16> to vector<32x32xbf16>
    %61 = arith.truncf %54 : vector<32x32xf32> to vector<32x32xbf16>
    %cst_43 = arith.constant dense<0.000000e+00> : vector<32x32xf32>
    %62 = tpu.matmul %61, %60, %cst_43 {dimension_numbers = #tpu.dot_dimension_numbers<[1], [0], [0], [1], [0, 0, 1, 1], [], []>} : vector<32x32xbf16>, vector<32x32xbf16>, vector<32x32xf32> -> vector<32x32xf32>
    %63 = arith.addf %59, %62 : vector<32x32xf32>
    %c0_44 = arith.constant 0 : index
    %c0_45 = arith.constant 0 : index
    %c0_46 = arith.constant 0 : index
    %64 = vector.load %arg17[%c0_44, %c0_45, %c0_46] : memref<3x1x32xf32, #tpu.memory_space<vmem>>, vector<1x1x32xf32>
    %65 = vector.shape_cast %64 : vector<1x1x32xf32> to vector<1x32xf32>
    %66 = vector.broadcast %65 : vector<1x32xf32> to vector<32x32xf32>
    %67 = arith.addf %63, %66 : vector<32x32xf32>
    %68 = math.tanh %67 : vector<32x32xf32>
    %69 = vector.extract_strided_slice %39 {offsets = [32, 0], sizes = [32, 256], strides = [1, 1]} : vector<128x256xbf16> to vector<32x256xbf16>
    %70 = arith.truncf %68 : vector<32x32xf32> to vector<32x32xbf16>
    %cst_47 = arith.constant dense<0.000000e+00> : vector<32x256xf32>
    %71 = tpu.matmul %70, %69, %cst_47 {dimension_numbers = #tpu.dot_dimension_numbers<[1], [0], [0], [1], [0, 0, 1, 1], [], []>} : vector<32x32xbf16>, vector<32x256xbf16>, vector<32x256xf32> -> vector<32x256xf32>
    %72 = arith.addf %42, %71 : vector<32x256xf32>
    %c1 = arith.constant 1 : index
    %c0_48 = arith.constant 0 : index
    %c0_49 = arith.constant 0 : index
    %73 = vector.load %arg15[%c1, %c0_48, %c0_49] : memref<3x32x32xbf16, #tpu.memory_space<vmem>>, vector<1x32x32xbf16>
    %74 = vector.shape_cast %73 : vector<1x32x32xbf16> to vector<32x32xbf16>
    %75 = arith.truncf %68 : vector<32x32xf32> to vector<32x32xbf16>
    %cst_50 = arith.constant dense<0.000000e+00> : vector<32x32xf32>
    %76 = tpu.matmul %75, %74, %cst_50 {dimension_numbers = #tpu.dot_dimension_numbers<[1], [0], [0], [1], [0, 0, 1, 1], [], []>} : vector<32x32xbf16>, vector<32x32xbf16>, vector<32x32xf32> -> vector<32x32xf32>
    %77 = arith.truncf %38 : vector<32x32xf32> to vector<32x32xbf16>
    %78 = arith.truncf %76 : vector<32x32xf32> to vector<32x32xbf16>
    %cst_51 = arith.constant dense<0.000000e+00> : vector<32x32xf32>
    %79 = tpu.matmul %77, %78, %cst_51 {dimension_numbers = #tpu.dot_dimension_numbers<[1], [0], [0], [1], [0, 0, 1, 1], [], []>} : vector<32x32xbf16>, vector<32x32xbf16>, vector<32x32xf32> -> vector<32x32xf32>
    %80 = math.tanh %79 : vector<32x32xf32>
    %81 = arith.truncf %22 : vector<32x32xf32> to vector<32x32xbf16>
    %82 = arith.truncf %80 : vector<32x32xf32> to vector<32x32xbf16>
    %cst_52 = arith.constant dense<0.000000e+00> : vector<32x32xf32>
    %83 = tpu.matmul %81, %82, %cst_52 {dimension_numbers = #tpu.dot_dimension_numbers<[1], [0], [0], [1], [0, 0, 1, 1], [], []>} : vector<32x32xbf16>, vector<32x32xbf16>, vector<32x32xf32> -> vector<32x32xf32>
    %84 = math.tanh %83 : vector<32x32xf32>
    %c1_53 = arith.constant 1 : index
    %c0_54 = arith.constant 0 : index
    %c0_55 = arith.constant 0 : index
    %85 = vector.load %arg16[%c1_53, %c0_54, %c0_55] : memref<3x64x32xbf16, #tpu.memory_space<vmem>>, vector<1x64x32xbf16>
    %86 = vector.shape_cast %85 : vector<1x64x32xbf16> to vector<64x32xbf16>
    %87 = vector.extract_strided_slice %86 {offsets = [0, 0], sizes = [32, 32], strides = [1, 1]} : vector<64x32xbf16> to vector<32x32xbf16>
    %88 = arith.truncf %80 : vector<32x32xf32> to vector<32x32xbf16>
    %cst_56 = arith.constant dense<0.000000e+00> : vector<32x32xf32>
    %89 = tpu.matmul %88, %87, %cst_56 {dimension_numbers = #tpu.dot_dimension_numbers<[1], [0], [0], [1], [0, 0, 1, 1], [], []>} : vector<32x32xbf16>, vector<32x32xbf16>, vector<32x32xf32> -> vector<32x32xf32>
    %90 = vector.extract_strided_slice %86 {offsets = [32, 0], sizes = [32, 32], strides = [1, 1]} : vector<64x32xbf16> to vector<32x32xbf16>
    %91 = arith.truncf %84 : vector<32x32xf32> to vector<32x32xbf16>
    %cst_57 = arith.constant dense<0.000000e+00> : vector<32x32xf32>
    %92 = tpu.matmul %91, %90, %cst_57 {dimension_numbers = #tpu.dot_dimension_numbers<[1], [0], [0], [1], [0, 0, 1, 1], [], []>} : vector<32x32xbf16>, vector<32x32xbf16>, vector<32x32xf32> -> vector<32x32xf32>
    %93 = arith.addf %89, %92 : vector<32x32xf32>
    %c1_58 = arith.constant 1 : index
    %c0_59 = arith.constant 0 : index
    %c0_60 = arith.constant 0 : index
    %94 = vector.load %arg17[%c1_58, %c0_59, %c0_60] : memref<3x1x32xf32, #tpu.memory_space<vmem>>, vector<1x1x32xf32>
    %95 = vector.shape_cast %94 : vector<1x1x32xf32> to vector<1x32xf32>
    %96 = vector.broadcast %95 : vector<1x32xf32> to vector<32x32xf32>
    %97 = arith.addf %93, %96 : vector<32x32xf32>
    %98 = math.tanh %97 : vector<32x32xf32>
    %99 = vector.extract_strided_slice %39 {offsets = [64, 0], sizes = [32, 256], strides = [1, 1]} : vector<128x256xbf16> to vector<32x256xbf16>
    %100 = arith.truncf %98 : vector<32x32xf32> to vector<32x32xbf16>
    %cst_61 = arith.constant dense<0.000000e+00> : vector<32x256xf32>
    %101 = tpu.matmul %100, %99, %cst_61 {dimension_numbers = #tpu.dot_dimension_numbers<[1], [0], [0], [1], [0, 0, 1, 1], [], []>} : vector<32x32xbf16>, vector<32x256xbf16>, vector<32x256xf32> -> vector<32x256xf32>
    %102 = arith.addf %72, %101 : vector<32x256xf32>
    %c2 = arith.constant 2 : index
    %c0_62 = arith.constant 0 : index
    %c0_63 = arith.constant 0 : index
    %103 = vector.load %arg15[%c2, %c0_62, %c0_63] : memref<3x32x32xbf16, #tpu.memory_space<vmem>>, vector<1x32x32xbf16>
    %104 = vector.shape_cast %103 : vector<1x32x32xbf16> to vector<32x32xbf16>
    %105 = arith.truncf %98 : vector<32x32xf32> to vector<32x32xbf16>
    %cst_64 = arith.constant dense<0.000000e+00> : vector<32x32xf32>
    %106 = tpu.matmul %105, %104, %cst_64 {dimension_numbers = #tpu.dot_dimension_numbers<[1], [0], [0], [1], [0, 0, 1, 1], [], []>} : vector<32x32xbf16>, vector<32x32xbf16>, vector<32x32xf32> -> vector<32x32xf32>
    %107 = arith.truncf %38 : vector<32x32xf32> to vector<32x32xbf16>
    %108 = arith.truncf %106 : vector<32x32xf32> to vector<32x32xbf16>
    %cst_65 = arith.constant dense<0.000000e+00> : vector<32x32xf32>
    %109 = tpu.matmul %107, %108, %cst_65 {dimension_numbers = #tpu.dot_dimension_numbers<[1], [0], [0], [1], [0, 0, 1, 1], [], []>} : vector<32x32xbf16>, vector<32x32xbf16>, vector<32x32xf32> -> vector<32x32xf32>
    %110 = math.tanh %109 : vector<32x32xf32>
    %111 = arith.truncf %22 : vector<32x32xf32> to vector<32x32xbf16>
    %112 = arith.truncf %110 : vector<32x32xf32> to vector<32x32xbf16>
    %cst_66 = arith.constant dense<0.000000e+00> : vector<32x32xf32>
    %113 = tpu.matmul %111, %112, %cst_66 {dimension_numbers = #tpu.dot_dimension_numbers<[1], [0], [0], [1], [0, 0, 1, 1], [], []>} : vector<32x32xbf16>, vector<32x32xbf16>, vector<32x32xf32> -> vector<32x32xf32>
    %114 = math.tanh %113 : vector<32x32xf32>
    %c2_67 = arith.constant 2 : index
    %c0_68 = arith.constant 0 : index
    %c0_69 = arith.constant 0 : index
    %115 = vector.load %arg16[%c2_67, %c0_68, %c0_69] : memref<3x64x32xbf16, #tpu.memory_space<vmem>>, vector<1x64x32xbf16>
    %116 = vector.shape_cast %115 : vector<1x64x32xbf16> to vector<64x32xbf16>
    %117 = vector.extract_strided_slice %116 {offsets = [0, 0], sizes = [32, 32], strides = [1, 1]} : vector<64x32xbf16> to vector<32x32xbf16>
    %118 = arith.truncf %110 : vector<32x32xf32> to vector<32x32xbf16>
    %cst_70 = arith.constant dense<0.000000e+00> : vector<32x32xf32>
    %119 = tpu.matmul %118, %117, %cst_70 {dimension_numbers = #tpu.dot_dimension_numbers<[1], [0], [0], [1], [0, 0, 1, 1], [], []>} : vector<32x32xbf16>, vector<32x32xbf16>, vector<32x32xf32> -> vector<32x32xf32>
    %120 = vector.extract_strided_slice %116 {offsets = [32, 0], sizes = [32, 32], strides = [1, 1]} : vector<64x32xbf16> to vector<32x32xbf16>
    %121 = arith.truncf %114 : vector<32x32xf32> to vector<32x32xbf16>
    %cst_71 = arith.constant dense<0.000000e+00> : vector<32x32xf32>
    %122 = tpu.matmul %121, %120, %cst_71 {dimension_numbers = #tpu.dot_dimension_numbers<[1], [0], [0], [1], [0, 0, 1, 1], [], []>} : vector<32x32xbf16>, vector<32x32xbf16>, vector<32x32xf32> -> vector<32x32xf32>
    %123 = arith.addf %119, %122 : vector<32x32xf32>
    %c2_72 = arith.constant 2 : index
    %c0_73 = arith.constant 0 : index
    %c0_74 = arith.constant 0 : index
    %124 = vector.load %arg17[%c2_72, %c0_73, %c0_74] : memref<3x1x32xf32, #tpu.memory_space<vmem>>, vector<1x1x32xf32>
    %125 = vector.shape_cast %124 : vector<1x1x32xf32> to vector<1x32xf32>
    %126 = vector.broadcast %125 : vector<1x32xf32> to vector<32x32xf32>
    %127 = arith.addf %123, %126 : vector<32x32xf32>
    %128 = math.tanh %127 : vector<32x32xf32>
    %129 = vector.extract_strided_slice %39 {offsets = [96, 0], sizes = [32, 256], strides = [1, 1]} : vector<128x256xbf16> to vector<32x256xbf16>
    %130 = arith.truncf %128 : vector<32x32xf32> to vector<32x32xbf16>
    %cst_75 = arith.constant dense<0.000000e+00> : vector<32x256xf32>
    %131 = tpu.matmul %130, %129, %cst_75 {dimension_numbers = #tpu.dot_dimension_numbers<[1], [0], [0], [1], [0, 0, 1, 1], [], []>} : vector<32x32xbf16>, vector<32x256xbf16>, vector<32x256xf32> -> vector<32x256xf32>
    %132 = arith.addf %102, %131 : vector<32x256xf32>
    %c0_76 = arith.constant 0 : index
    %c0_77 = arith.constant 0 : index
    %133 = vector.load %arg19[%c0_76, %c0_77] : memref<1x256xf32, #tpu.memory_space<vmem>>, vector<1x256xf32>
    %134 = vector.broadcast %133 : vector<1x256xf32> to vector<32x256xf32>
    %135 = arith.addf %132, %134 : vector<32x256xf32>
    %136 = math.tanh %135 : vector<32x256xf32>
    %c0_78 = arith.constant 0 : index
    %c0_79 = arith.constant 0 : index
    %137 = vector.load %arg20[%c0_78, %c0_79] : memref<256x64xbf16, #tpu.memory_space<vmem>>, vector<256x64xbf16>
    %138 = arith.truncf %136 : vector<32x256xf32> to vector<32x256xbf16>
    %cst_80 = arith.constant dense<0.000000e+00> : vector<32x64xf32>
    %139 = tpu.matmul %138, %137, %cst_80 {dimension_numbers = #tpu.dot_dimension_numbers<[1], [0], [0], [1], [0, 0, 1, 1], [], []>} : vector<32x256xbf16>, vector<256x64xbf16>, vector<32x64xf32> -> vector<32x64xf32>
    %c0_81 = arith.constant 0 : index
    %c0_82 = arith.constant 0 : index
    %140 = vector.load %arg21[%c0_81, %c0_82] : memref<1x64xf32, #tpu.memory_space<vmem>>, vector<1x64xf32>
    %141 = vector.broadcast %140 : vector<1x64xf32> to vector<32x64xf32>
    %142 = arith.addf %139, %141 : vector<32x64xf32>
    %143 = vector.extract_strided_slice %142 {offsets = [0, 0], sizes = [32, 32], strides = [1, 1]} : vector<32x64xf32> to vector<32x32xf32>
    %144 = vector.extract_strided_slice %142 {offsets = [0, 32], sizes = [32, 32], strides = [1, 1]} : vector<32x64xf32> to vector<32x32xf32>
    %c0_83 = arith.constant 0 : index
    %c0_84 = arith.constant 0 : index
    %145 = vector.load %arg4[%c0_83, %c0_84] : memref<32x32xf32, #tpu.memory_space<vmem>>, vector<32x32xf32>
    %cst_85 = arith.constant 5.000000e-01 : f32
    %146 = vector.broadcast %cst_85 : f32 to vector<32x32xf32>
    %147 = arith.mulf %146, %144 : vector<32x32xf32>
    %148 = math.exp %147 : vector<32x32xf32>
    %149 = arith.mulf %145, %148 : vector<32x32xf32>
    %150 = arith.addf %149, %143 : vector<32x32xf32>
    %c0_86 = arith.constant 0 : index
    %c0_87 = arith.constant 0 : index
    %151 = vector.load %arg22[%c0_86, %c0_87] : memref<32x128xf32, #tpu.memory_space<vmem>>, vector<32x32xf32>
    tpu.vector_store %arg22[%c0_86, %c0_87], %150 {strides = array<i32>} : memref<32x128xf32, #tpu.memory_space<vmem>>, vector<32x32xf32>,
    %c0_88 = arith.constant 0 : index
    %c32 = arith.constant 32 : index
    %152 = vector.load %arg22[%c0_88, %c32] : memref<32x128xf32, #tpu.memory_space<vmem>>, vector<32x32xf32>
    tpu.vector_store %arg22[%c0_88, %c32], %143 {strides = array<i32>} : memref<32x128xf32, #tpu.memory_space<vmem>>, vector<32x32xf32>,
    %c0_89 = arith.constant 0 : index
    %c64 = arith.constant 64 : index
    %153 = vector.load %arg22[%c0_89, %c64] : memref<32x128xf32, #tpu.memory_space<vmem>>, vector<32x32xf32>
    tpu.vector_store %arg22[%c0_89, %c64], %144 {strides = array<i32>} : memref<32x128xf32, #tpu.memory_space<vmem>>, vector<32x32xf32>,
    %cst_90 = arith.constant 0.000000e+00 : f32
    %154 = vector.broadcast %cst_90 : f32 to vector<32x32xf32>
    %c0_91 = arith.constant 0 : index
    %c96 = arith.constant 96 : index
    %155 = vector.load %arg22[%c0_91, %c96] : memref<32x128xf32, #tpu.memory_space<vmem>>, vector<32x32xf32>
    tpu.vector_store %arg22[%c0_91, %c96], %154 {strides = array<i32>} : memref<32x128xf32, #tpu.memory_space<vmem>>, vector<32x32xf32>,
    return
  }
  func.func @transform_0(%arg0: i32) -> (i32, i32) {
    %c0_i32 = arith.constant 0 : i32
    %c0_i32_0 = arith.constant 0 : i32
    return %arg0, %c0_i32 : i32, i32
  }
  func.func @transform_1(%arg0: i32) -> (i32, i32) {
    %c0_i32 = arith.constant 0 : i32
    %c0_i32_0 = arith.constant 0 : i32
    return %arg0, %c0_i32 : i32, i32
  }
  func.func @transform_2(%arg0: i32) -> (i32, i32) {
    %c0_i32 = arith.constant 0 : i32
    %c0_i32_0 = arith.constant 0 : i32
    return %arg0, %c0_i32 : i32, i32
  }
  func.func @transform_3(%arg0: i32) -> (i32, i32) {
    %c0_i32 = arith.constant 0 : i32
    %c0_i32_0 = arith.constant 0 : i32
    return %arg0, %c0_i32 : i32, i32
  }
  func.func @transform_4(%arg0: i32) -> (i32, i32) {
    %c0_i32 = arith.constant 0 : i32
    %c0_i32_0 = arith.constant 0 : i32
    %c0_i32_1 = arith.constant 0 : i32
    return %c0_i32, %c0_i32_0 : i32, i32
  }
  func.func @transform_5(%arg0: i32) -> (i32, i32) {
    %c0_i32 = arith.constant 0 : i32
    %c0_i32_0 = arith.constant 0 : i32
    %c0_i32_1 = arith.constant 0 : i32
    return %c0_i32, %c0_i32_0 : i32, i32
  }
  func.func @transform_6(%arg0: i32) -> (i32, i32) {
    %c0_i32 = arith.constant 0 : i32
    %c0_i32_0 = arith.constant 0 : i32
    %c0_i32_1 = arith.constant 0 : i32
    return %c0_i32, %c0_i32_0 : i32, i32
  }
  func.func @transform_7(%arg0: i32) -> (i32, i32) {
    %c0_i32 = arith.constant 0 : i32
    %c0_i32_0 = arith.constant 0 : i32
    %c0_i32_1 = arith.constant 0 : i32
    return %c0_i32, %c0_i32_0 : i32, i32
  }
  func.func @transform_8(%arg0: i32) -> (i32, i32) {
    %c0_i32 = arith.constant 0 : i32
    %c0_i32_0 = arith.constant 0 : i32
    %c0_i32_1 = arith.constant 0 : i32
    return %c0_i32, %c0_i32_0 : i32, i32
  }
  func.func @transform_9(%arg0: i32) -> (i32, i32) {
    %c0_i32 = arith.constant 0 : i32
    %c0_i32_0 = arith.constant 0 : i32
    %c0_i32_1 = arith.constant 0 : i32
    return %c0_i32, %c0_i32_0 : i32, i32
  }
  func.func @transform_10(%arg0: i32) -> (i32, i32) {
    %c0_i32 = arith.constant 0 : i32
    %c0_i32_0 = arith.constant 0 : i32
    %c0_i32_1 = arith.constant 0 : i32
    return %c0_i32, %c0_i32_0 : i32, i32
  }
  func.func @transform_11(%arg0: i32) -> (i32, i32) {
    %c0_i32 = arith.constant 0 : i32
    %c0_i32_0 = arith.constant 0 : i32
    %c0_i32_1 = arith.constant 0 : i32
    return %c0_i32, %c0_i32_0 : i32, i32
  }
  func.func @transform_12(%arg0: i32) -> (i32, i32) {
    %c0_i32 = arith.constant 0 : i32
    %c0_i32_0 = arith.constant 0 : i32
    %c0_i32_1 = arith.constant 0 : i32
    return %c0_i32, %c0_i32_0 : i32, i32
  }
  func.func @transform_13(%arg0: i32) -> (i32, i32) {
    %c0_i32 = arith.constant 0 : i32
    %c0_i32_0 = arith.constant 0 : i32
    %c0_i32_1 = arith.constant 0 : i32
    return %c0_i32, %c0_i32_0 : i32, i32
  }
  func.func @transform_14(%arg0: i32) -> (i32, i32, i32) {
    %c0_i32 = arith.constant 0 : i32
    %c0_i32_0 = arith.constant 0 : i32
    %c0_i32_1 = arith.constant 0 : i32
    %c0_i32_2 = arith.constant 0 : i32
    return %c0_i32, %c0_i32_0, %c0_i32_1 : i32, i32, i32
  }
  func.func @transform_15(%arg0: i32) -> (i32, i32, i32) {
    %c0_i32 = arith.constant 0 : i32
    %c0_i32_0 = arith.constant 0 : i32
    %c0_i32_1 = arith.constant 0 : i32
    %c0_i32_2 = arith.constant 0 : i32
    return %c0_i32, %c0_i32_0, %c0_i32_1 : i32, i32, i32
  }
  func.func @transform_16(%arg0: i32) -> (i32, i32, i32) {
    %c0_i32 = arith.constant 0 : i32
    %c0_i32_0 = arith.constant 0 : i32
    %c0_i32_1 = arith.constant 0 : i32
    %c0_i32_2 = arith.constant 0 : i32
    return %c0_i32, %c0_i32_0, %c0_i32_1 : i32, i32, i32
  }
  func.func @transform_17(%arg0: i32) -> (i32, i32) {
    %c0_i32 = arith.constant 0 : i32
    %c0_i32_0 = arith.constant 0 : i32
    %c0_i32_1 = arith.constant 0 : i32
    return %c0_i32, %c0_i32_0 : i32, i32
  }
  func.func @transform_18(%arg0: i32) -> (i32, i32) {
    %c0_i32 = arith.constant 0 : i32
    %c0_i32_0 = arith.constant 0 : i32
    %c0_i32_1 = arith.constant 0 : i32
    return %c0_i32, %c0_i32_0 : i32, i32
  }
  func.func @transform_19(%arg0: i32) -> (i32, i32) {
    %c0_i32 = arith.constant 0 : i32
    %c0_i32_0 = arith.constant 0 : i32
    %c0_i32_1 = arith.constant 0 : i32
    return %c0_i32, %c0_i32_0 : i32, i32
  }
  func.func @transform_20(%arg0: i32) -> (i32, i32) {
    %c0_i32 = arith.constant 0 : i32
    %c0_i32_0 = arith.constant 0 : i32
    %c0_i32_1 = arith.constant 0 : i32
    return %c0_i32, %c0_i32_0 : i32, i32
  }
  func.func @transform_21(%arg0: i32) -> (i32, i32) {
    %c0_i32 = arith.constant 0 : i32
    %c0_i32_0 = arith.constant 0 : i32
    return %arg0, %c0_i32 : i32, i32
  }
}

</mosaic_0001>

<bundles_post_ra>
// kernel: tpu_custom_call.1
= control target key start
LH: loop header
LB: loop body
LE: loop exit
PB: predicated region body
PF: predicated region fallthrough
CT: control target
= control target key end

     0   :  { %s4730_s0 = inlined_call_operand.vmem [shape: f32[32,32], index: 0, kind: input, shape index: {}]   ;;  %s4731_s1 = inlined_call_operand.vmem [shape: f32[32,4], index: 1, kind: input, shape index: {}]   ;;  %s4732_s2 = inlined_call_operand.vmem [shape: f32[256,4], index: 2, kind: input, shape index: {}]   ;;  %s4733_s3 = inlined_call_operand.vmem [shape: f32[32,32], index: 3, kind: input, shape index: {}]   ;;  %s4734_s4 = inlined_call_operand.vmem [shape: f32[8,32], index: 4, kind: input, shape index: {}]   ;;  %s4735_s5 = inlined_call_operand.vmem [shape: f32[32,32], index: 5, kind: input, shape index: {}]   ;;  %s4736_s6 = inlined_call_operand.vmem [shape: bf16[4,128], index: 6, kind: input, shape index: {}]   ;;  %s4737_s7 = inlined_call_operand.vmem [shape: f32[1,128], index: 7, kind: input, shape index: {}]   ;;  %s4738_s8 = inlined_call_operand.vmem [shape: bf16[128,32], index: 8, kind: input, shape index: {}]   ;;  %s4739_s9 = inlined_call_operand.vmem [shape: f32[1,32], index: 9, kind: input, shape index: {}]   ;;  %s4740_s10 = inlined_call_operand.vmem [shape: bf16[4,128], index: 10, kind: input, shape index: {}]   ;;  %s4741_s11 = inlined_call_operand.vmem [shape: f32[1,128], index: 11, kind: input, shape index: {}]   ;;  %s4742_s12 = inlined_call_operand.vmem [shape: bf16[128,32], index: 12, kind: input, shape index: {}]   ;;  %s4743_s13 = inlined_call_operand.vmem [shape: f32[1,32], index: 13, kind: input, shape index: {}]   ;;  %s4744_s14 = inlined_call_operand.vmem [shape: bf16[3,32,32], index: 14, kind: input, shape index: {}]   ;;  %s4745_s15 = inlined_call_operand.vmem [shape: bf16[3,64,32], index: 15, kind: input, shape index: {}]   ;;  %s4746_s16 = inlined_call_operand.vmem [shape: f32[3,1,32], index: 16, kind: input, shape index: {}]   ;;  %s4747_s17 = inlined_call_operand.vmem [shape: bf16[128,256], index: 17, kind: input, shape index: {}]   ;;  %s4748_s18 = inlined_call_operand.vmem [shape: f32[1,256], index: 18, kind: input, shape index: {}]   ;;  %s4749_s19 = inlined_call_operand.vmem [shape: bf16[256,64], index: 19, kind: input, shape index: {}]   ;;  %s4750_s20 = inlined_call_operand.vmem [shape: f32[1,64], index: 20, kind: input, shape index: {}]   ;;  %s4751_s21 = inlined_call_operand.hbm [shape: f32[32,128], index: 21, kind: output, shape index: {}]  }
   0x1   :  { %4757 = sst [smem:[#allocation5_spill]] %s4730_s0 }
   0x2   :  { %4758 = sst [smem:[#allocation6_spill]] %s4731_s1 }
   0x3   :  { %4759 = sst [smem:[#allocation7_spill]] %s4732_s2 }
   0x4   :  { %4760 = sst [smem:[#allocation8_spill]] %s4733_s3 }
   0x5   :  { %4761 = sst [smem:[#allocation9_spill]] %s4734_s4 }
   0x6   :  { %4762 = sst [smem:[#allocation10_spill]] %s4735_s5 }
   0x7   :  { %v102_v0 = vld [vmem:[%s4736_s6] sm:$0x3]  ;;  %vm175_vm0 = vcmask 1041408   ;;  %s4763_s3 = sld [smem:[#allocation7_spill]]  ;;  %vm126_vm1 = vcmask 31744   ;;  %v3562_v33 = vld [vmem:[%s4738_s8 + $0x8] sm:$0xff]  }
   0x8   :  { %3550 = vmatprep.subr.msk.bf16.mxu0 %vm175_vm0, %v102_v0  ;;  %v177_v3 = vsel %vm175_vm0, %v102_v0, 0  ;;  %3551 = vmatprep.subr.msk.bf16.mxu1 %vm175_vm0, %v102_v0  ;;  %v3561_v30 = vld [vmem:[%s4738_s8] sm:$0xff]   ;;  %v3563_v37 = vld [vmem:[%s4738_s8 + $0x10] sm:$0xff]  }
   0x9   :  { %3279 = vmatpush3.bf16.msra.mxu0 %v177_v3  ;;  %3513 = vmatpush3.bf16.msra.mxu1 %v177_v3 }
   0xa   :  { %3312 = vmatprep.subr.bf16.mxu1 %v3561_v30 }
   0xd   :  { %v70_v1 = vld [vmem:[%s4763_s3] sm:$0xff]  ;;  %v71_v2 = vld [vmem:[%s4763_s3 + $0x8] sm:$0xff]  ;;  %v72_v5 = vld [vmem:[%s4763_s3 + $0x10] sm:$0xff] }
   0xe   :  { %v103_v4 = vpack.c.bf16 %v71_v2, %v70_v1  ;;  %v73_v6 = vld [vmem:[%s4763_s3 + $0x18] sm:$0xff]  ;;  %v74_v7 = vld [vmem:[%s4763_s3 + $0x20] sm:$0xff]  ;;  %v75_v9 = vld [vmem:[%s4763_s3 + $0x28] sm:$0xff] }
   0xf   :  { %v104_v8 = vpack.c.bf16 %v73_v6, %v72_v5  ;;  %v105_v10 = vpack.c.bf16 %v75_v9, %v74_v7  ;;  %v76_v11 = vld [vmem:[%s4763_s3 + $0x30] sm:$0xff]  ;;  %v77_v12 = vld [vmem:[%s4763_s3 + $0x38] sm:$0xff]  ;;  %v78_v13 = vld [vmem:[%s4763_s3 + $0x40] sm:$0xff] }
  0x10   :  { %3280 = vmatprep.mubr.msk.bf16.mxu0 %vm126_vm1, %v103_v4  ;;  %v86_v14 = vld [vmem:[%s4763_s3 + $0x80] sm:$0xff]  ;;  %v87_v15 = vld [vmem:[%s4763_s3 + $0x88] sm:$0xff]  ;;  %v88_v16 = vld [vmem:[%s4763_s3 + $0x90] sm:$0xff]  ;;  %v106_v24 = vpack.c.bf16 %v77_v12, %v76_v11 }
  0x11   :  { %3281 = vmatmul.mubr.msk.bf16.vlgmr.msra.gmra.mrb[0].mxu0 %vm126_vm1, %v104_v8  ;;  %v89_v17 = vld [vmem:[%s4763_s3 + $0x98] sm:$0xff]  ;;  %v79_v18 = vld [vmem:[%s4763_s3 + $0x48] sm:$0xff]  ;;  %v111_v19 = vpack.c.bf16 %v87_v15, %v86_v14  ;;  %v90_v21 = vld [vmem:[%s4763_s3 + $0xa0] sm:$0xff] }
  0x12   :  { %3284 = vmatprep.mubr.msk.bf16.mxu0 %vm126_vm1, %v105_v10  ;;  %v112_v20 = vpack.c.bf16 %v89_v17, %v88_v16  ;;  %v91_v22 = vld [vmem:[%s4763_s3 + $0xa8] sm:$0xff]  ;;  %v92_v25 = vld [vmem:[%s4763_s3 + $0xb0] sm:$0xff]  ;;  %v107_v26 = vpack.c.bf16 %v79_v18, %v78_v13  ;;  %v93_v27 = vld [vmem:[%s4763_s3 + $0xb8] sm:$0xff] }
  0x13   :  { %v113_v23 = vpack.c.bf16 %v91_v22, %v90_v21  ;;  %3296 = vmatprep.mubr.msk.bf16.mxu1 %vm126_vm1, %v111_v19  ;;  %v94_v28 = vld [vmem:[%s4763_s3 + $0xc0] sm:$0xff]  ;;  %v95_v29 = vld [vmem:[%s4763_s3 + $0xc8] sm:$0xff]  ;;  %v80_v31 = vld [vmem:[%s4763_s3 + $0x50] sm:$0xff]  ;;  %v114_v36 = vpack.c.bf16 %v93_v27, %v92_v25 }
  0x14   :  { %3297 = vmatmul.mubr.msk.bf16.vlgmr.msra.gmra.mrb[0].mxu1 %vm126_vm1, %v112_v20  ;;  %v81_v32 = vld [vmem:[%s4763_s3 + $0x58] sm:$0xff]  ;;  %v82_v34 = vld [vmem:[%s4763_s3 + $0x60] sm:$0xff]  ;;  %v83_v35 = vld [vmem:[%s4763_s3 + $0x68] sm:$0xff]  ;;  %v115_v38 = vpack.c.bf16 %v95_v29, %v94_v28 }
  0x15   :  { %3300 = vmatprep.mubr.msk.bf16.mxu1 %vm126_vm1, %v113_v23  ;;  %3313 = vmatpush3.bf16.msra.mxu1 %v3561_v30  ;;  %v108_v39 = vpack.c.bf16 %v81_v32, %v80_v31  ;;  %v96_v40 = vld [vmem:[%s4763_s3 + $0xd0] sm:$0xff]  ;;  %v97_v41 = vld [vmem:[%s4763_s3 + $0xd8] sm:$0xff]  ;;  %v109_v42 = vpack.c.bf16 %v83_v35, %v82_v34  ;;  %v98_v43 = vld [vmem:[%s4763_s3 + $0xe0] sm:$0xff] }
  0x16   :  { %3314 = vmatprep.subr.bf16.mxu1 %v3562_v33  ;;  %v99_v44 = vld [vmem:[%s4763_s3 + $0xe8] sm:$0xff]  ;;  %v84_v45 = vld [vmem:[%s4763_s3 + $0x70] sm:$0xff]  ;;  %v85_v46 = vld [vmem:[%s4763_s3 + $0x78] sm:$0xff]  ;;  %v116_v47 = vpack.c.bf16 %v97_v41, %v96_v40 }
  0x17   :  { %v117_v48 = vpack.c.bf16 %v99_v44, %v98_v43  ;;  %v110_v49 = vpack.c.bf16 %v85_v46, %v84_v45  ;;  %v100_v50 = vld [vmem:[%s4763_s3 + $0xf0] sm:$0xff]  ;;  %v101_v51 = vld [vmem:[%s4763_s3 + $0xf8] sm:$0xff] }
  0x18   :  { %v118_v52 = vpack.c.bf16 %v101_v51, %v100_v50 }
  0x19   :  { %3285 = vmatmul.mubr.msk.bf16.gmra.mrb[4].mxu0 %vm126_vm1, %v106_v24  ;;  %3315 = vmatpush3.bf16.msra.mxu1 %v3562_v33 }
  0x1a   :  { %3288 = vmatprep.mubr.msk.bf16.mxu0 %vm126_vm1, %v107_v26  ;;  %3316 = vmatprep.subr.bf16.mxu1 %v3563_v37 }
  0x1c   :  { %3301 = vmatmul.mubr.msk.bf16.gmra.mrb[4].mxu1 %vm126_vm1, %v114_v36 }
  0x1d   :  { %3304 = vmatprep.mubr.msk.bf16.mxu1 %vm126_vm1, %v115_v38  ;;  %3317 = vmatpush3.bf16.msra.mxu1 %v3563_v37 }
  0x21   :  { %3289 = vmatmul.mubr.msk.bf16.gmra.mrb[8].mxu0 %vm126_vm1, %v108_v39 }
  0x22   :  { %3292 = vmatprep.mubr.msk.bf16.mxu0 %vm126_vm1, %v109_v42 }
  0x24   :  { %3305 = vmatmul.mubr.msk.bf16.gmra.mrb[8].mxu1 %vm126_vm1, %v116_v47 }
  0x25   :  { %3308 = vmatprep.mubr.msk.bf16.mxu1 %vm126_vm1, %v117_v48 }
  0x29   :  { %3293 = vmatmul.mubr.msk.bf16.gmra.mrb[12].mxu0 %vm126_vm1, %v110_v49 }
  0x2c   :  { %3309 = vmatmul.mubr.msk.bf16.gmra.mrb[12].mxu1 %vm126_vm1, %v118_v52 }
  0x2d   :  { %26 = vsyncpa [#allocation3], 0  ;;  %v3564_v53 = vld [vmem:[%s4738_s8 + $0x18] sm:$0xff]   ;;  %v3565_v54 = vld [vmem:[%s4738_s8 + $0x20] sm:$0xff]   ;;  %vm652_vm2 = vcmask 261120   ;;  %s4764_s30 = sld [smem:[#allocation9_spill]] }
  0x2e   :  { %3318 = vmatprep.subr.bf16.mxu1 %v3564_v53  ;;  %v3566_v55 = vld [vmem:[%s4738_s8 + $0x28] sm:$0xff]   ;;  %v3567_v56 = vld [vmem:[%s4738_s8 + $0x30] sm:$0xff]   ;;  %v3568_v57 = vld [vmem:[%s4738_s8 + $0x38] sm:$0xff]   ;;  %vm1021_vm3 = vcmask 1043456   ;;  %vm977_vm4 = vcmask 1041409   ;;  %vm979_vm5 = vcmask 1042434  }
  0x2f   :  { %3319 = vmatpush3.bf16.msra.mxu1 %v3564_v53  ;;  %v4161_v58 = vld [vmem:[%s4737_s7] ss:$0 sm:$0xff]  ;;  %vm981_vm6 = vcmask 1043459   ;;  %vm983_vm7 = vcmask 1044484   ;;  %vm985_vm8 = vcmask 1045509   ;;  %vm987_vm9 = vcmask 1046534  }
  0x30   :  { %3320 = vmatprep.subr.bf16.mxu1 %v3565_v54  ;;  %vm989_vm10 = vcmask 1047559   ;;  %vm1014_vm11 = vcmask 64512   ;;  %s4765_s4 = sld [smem:[#allocation6_spill]]  ;;  %s4766_s26 = sld [smem:[#allocation10_spill]]  ;;  %vm2944_vm12 = vcmask 523520   ;;  %vm2949_vm13 = vcmask 785920  }
  0x31   :  { %s4767_s1 = sld [smem:[#allocation5_spill]]  ;;  %s4768_s7 = sld [smem:[#allocation8_spill]]  ;;  %vm2954_vm14 = vcmask 1048320  }
  0x32   :  { %s3903_s22 = smov [#allocation2]  }
  0x33   :  { %3321 = vmatpush3.bf16.msra.mxu1 %v3565_v54 }
  0x34   :  { %3322 = vmatprep.subr.bf16.mxu1 %v3566_v55 }
  0x37   :  { %3323 = vmatpush3.bf16.msra.mxu1 %v3566_v55 }
  0x38   :  { %3324 = vmatprep.subr.bf16.mxu1 %v3567_v56 }
  0x3b   :  { %3325 = vmatpush3.bf16.msra.mxu1 %v3567_v56 }
  0x3c   :  { %3326 = vmatprep.subr.bf16.mxu1 %v3568_v57 }
  0x3f   :  { %3327 = vmatpush3.bf16.msra.mxu1 %v3568_v57 }
  0xe4   :  { %v3282_v59 = vpop.f32.mrb[0].mxu0 }
  0xe5   :  { %v222_v60 = vadd.f32 %v3282_v59, %v4161_v58  ;;  %v213_v61 = vpop.f32.mrb[1].mxu0 }
  0xe6   :  { %v214_v62 = vadd.f32 %v4161_v58, %v213_v61  ;;  %v3283_v63 = vpop.f32.mrb[2].mxu0 }
  0xe7   :  { %3635 = vtanh.f32 %v222_v60  ;;  %v225_v0 = vadd.f32 %v3283_v63, %v4161_v58  ;;  %v216_v1 = vpop.f32.mrb[3].mxu0  ;;  %v3298_v3 = vpop.f32.mrb[0].mxu1 }
  0xe8   :  { %3637 = vtanh.f32 %v214_v62  ;;  %v217_v2 = vadd.f32 %v4161_v58, %v216_v1  ;;  %v286_v4 = vadd.f32 %v3298_v3, %v4161_v58  ;;  %v277_v5 = vpop.f32.mrb[1].mxu1 }
  0xe9   :  { %3639 = vtanh.f32 %v225_v0  ;;  %v278_v6 = vadd.f32 %v4161_v58, %v277_v5  ;;  %v3299_v7 = vpop.f32.mrb[2].mxu1 }
  0xea   :  { %3641 = vtanh.f32 %v217_v2  ;;  %v289_v9 = vadd.f32 %v3299_v7, %v4161_v58  ;;  %v280_v10 = vpop.f32.mrb[3].mxu1 }
  0xeb   :  { %3643 = vtanh.f32 %v286_v4  ;;  %v281_v17 = vadd.f32 %v4161_v58, %v280_v10 }
  0xec   :  { %v3286_v8 = vpop.f32.mrb[4].mxu0  ;;  %3645 = vtanh.f32 %v278_v6 }
  0xed   :  { %v238_v11 = vadd.f32 %v3286_v8, %v4161_v58  ;;  %v229_v12 = vpop.f32.mrb[5].mxu0  ;;  %3647 = vtanh.f32 %v289_v9 }
  0xee   :  { %v230_v13 = vadd.f32 %v4161_v58, %v229_v12  ;;  %v3287_v14 = vpop.f32.mrb[6].mxu0 }
  0xef   :  { %3649 = vtanh.f32 %v238_v11  ;;  %v241_v15 = vadd.f32 %v3287_v14, %v4161_v58  ;;  %v232_v16 = vpop.f32.mrb[7].mxu0  ;;  %v3302_v20 = vpop.f32.mrb[4].mxu1 }
  0xf0   :  { %3651 = vtanh.f32 %v230_v13  ;;  %v233_v18 = vadd.f32 %v4161_v58, %v232_v16  ;;  %v302_v22 = vadd.f32 %v3302_v20, %v4161_v58  ;;  %v293_v23 = vpop.f32.mrb[5].mxu1 }
  0xf1   :  { %v3636_v19 = vpop.eup %3635  ;;  %3653 = vtanh.f32 %v241_v15  ;;  %v294_v25 = vadd.f32 %v4161_v58, %v293_v23  ;;  %v3303_v26 = vpop.f32.mrb[6].mxu1 }
  0xf2   :  { %v3638_v21 = vpop.eup %3637  ;;  %3655 = vtanh.f32 %v233_v18  ;;  %v305_v30 = vadd.f32 %v3303_v26, %v4161_v58  ;;  %v296_v31 = vpop.f32.mrb[7].mxu1 }
  0xf3   :  { %v3640_v24 = vpop.eup %3639  ;;  %3657 = vtanh.f32 %v281_v17  ;;  %v297_v41 = vadd.f32 %v4161_v58, %v296_v31 }
  0xf4   :  { %v3642_v27 = vpop.eup %3641  ;;  %v3290_v28 = vpop.f32.mrb[8].mxu0  ;;  %v389_v29 = vpack.c.bf16 %v3640_v24, %v3636_v19  ;;  %3659 = vtanh.f32 %v302_v22 }
  0xf5   :  { %v254_v32 = vadd.f32 %v3290_v28, %v4161_v58  ;;  %v245_v33 = vpop.f32.mrb[9].mxu0  ;;  %v388_v34 = vpack.c.bf16 %v3642_v27, %v3638_v21  ;;  %3661 = vtanh.f32 %v294_v25  ;;  %v4179_v35 = vpop.eup %3643 }
  0xf6   :  { %v246_v36 = vadd.f32 %v4161_v58, %v245_v33  ;;  %v3291_v37 = vpop.f32.mrb[10].mxu0  ;;  %3663 = vtanh.f32 %v305_v30  ;;  %v4182_v38 = vpop.eup %3645 }
  0xf7   :  { %3665 = vtanh.f32 %v254_v32  ;;  %v257_v39 = vadd.f32 %v3291_v37, %v4161_v58  ;;  %v248_v40 = vpop.f32.mrb[11].mxu0  ;;  %3328 = vmatprep.mubr.bf16.mxu1 %v388_v34  ;;  %v4186_v42 = vpop.eup %3647 }
  0xf8   :  { %3667 = vtanh.f32 %v246_v36  ;;  %v249_v43 = vadd.f32 %v4161_v58, %v248_v40  ;;  %3329 = vmatmul.mubr.bf16.vlgmr.msra.gmra.mrb[16].mxu1 %v389_v29  ;;  %v3306_v45 = vpop.f32.mrb[8].mxu1  ;;  %v397_v46 = vpack.c.bf16 %v4186_v42, %v4179_v35 }
  0xf9   :  { %v3650_v44 = vpop.eup %3649  ;;  %3669 = vtanh.f32 %v257_v39  ;;  %v318_v48 = vadd.f32 %v3306_v45, %v4161_v58  ;;  %v309_v49 = vpop.f32.mrb[9].mxu1  ;;  %v4216_v45 = vld [vmem:[%s4739_s9] ss:$0 sm:$0xff] }
  0xfa   :  { %v3652_v47 = vpop.eup %3651  ;;  %3671 = vtanh.f32 %v249_v43  ;;  %v310_v51 = vadd.f32 %v4161_v58, %v309_v49  ;;  %v3307_v52 = vpop.f32.mrb[10].mxu1 }
  0xfb   :  { %v3654_v50 = vpop.eup %3653  ;;  %3673 = vtanh.f32 %v297_v41  ;;  %v321_v56 = vadd.f32 %v3307_v52, %v4161_v58  ;;  %v312_v57 = vpop.f32.mrb[11].mxu1 }
  0xfc   :  { %v3656_v53 = vpop.eup %3655  ;;  %v3294_v54 = vpop.f32.mrb[12].mxu0  ;;  %v391_v55 = vpack.c.bf16 %v3654_v50, %v3650_v44  ;;  %3675 = vtanh.f32 %v318_v48  ;;  %v313_v6 = vadd.f32 %v4161_v58, %v312_v57 }
  0xfd   :  { %v4194_v59 = vpop.eup %3657  ;;  %v270_v60 = vadd.f32 %v3294_v54, %v4161_v58  ;;  %v261_v61 = vpop.f32.mrb[13].mxu0  ;;  %v390_v62 = vpack.c.bf16 %v3656_v53, %v3652_v47  ;;  %3677 = vtanh.f32 %v310_v51 }
  0xfe   :  { %v4197_v63 = vpop.eup %3659  ;;  %v262_v0 = vadd.f32 %v4161_v58, %v261_v61  ;;  %v3295_v1 = vpop.f32.mrb[14].mxu0  ;;  %3679 = vtanh.f32 %v321_v56  ;;  %v396_v2 = vpack.c.bf16 %v4194_v59, %v4182_v38 }
  0xff   :  { %v3662_v3 = vpop.eup %3661  ;;  %3681 = vtanh.f32 %v270_v60  ;;  %v273_v4 = vadd.f32 %v3295_v1, %v4161_v58  ;;  %v264_v5 = vpop.f32.mrb[15].mxu0  ;;  %3332 = vmatprep.mubr.bf16.mxu1 %v390_v62 }
 0x100   :  { %v3664_v7 = vpop.eup %3663  ;;  %3683 = vtanh.f32 %v262_v0  ;;  %v265_v8 = vadd.f32 %v4161_v58, %v264_v5  ;;  %3333 = vmatmul.mubr.bf16.gmra.mrb[20].mxu1 %v391_v55  ;;  %v3310_v10 = vpop.f32.mrb[12].mxu1 }
 0x101   :  { %v3666_v9 = vpop.eup %3665  ;;  %3685 = vtanh.f32 %v273_v4  ;;  %v399_v11 = vpack.c.bf16 %v3664_v7, %v4197_v63  ;;  %v334_v13 = vadd.f32 %v3310_v10, %v4161_v58  ;;  %v325_v14 = vpop.f32.mrb[13].mxu1 }
 0x102   :  { %v3668_v12 = vpop.eup %3667  ;;  %3687 = vtanh.f32 %v265_v8  ;;  %v326_v16 = vadd.f32 %v4161_v58, %v325_v14  ;;  %v3311_v17 = vpop.f32.mrb[14].mxu1 }
 0x103   :  { %v3670_v15 = vpop.eup %3669  ;;  %3689 = vtanh.f32 %v313_v6  ;;  %v337_v20 = vadd.f32 %v3311_v17, %v4161_v58  ;;  %v328_v21 = vpop.f32.mrb[15].mxu1 }
 0x104   :  { %v3672_v18 = vpop.eup %3671  ;;  %v393_v19 = vpack.c.bf16 %v3670_v15, %v3666_v9  ;;  %3691 = vtanh.f32 %v334_v13  ;;  %v329_v24 = vadd.f32 %v4161_v58, %v328_v21 }
 0x105   :  { %v3674_v22 = vpop.eup %3673  ;;  %v392_v23 = vpack.c.bf16 %v3672_v18, %v3668_v12  ;;  %3693 = vtanh.f32 %v326_v16 }
 0x106   :  { %v3676_v25 = vpop.eup %3675  ;;  %3695 = vtanh.f32 %v337_v20  ;;  %v398_v26 = vpack.c.bf16 %v3674_v22, %v3662_v3 }
 0x107   :  { %v3678_v27 = vpop.eup %3677  ;;  %3336 = vmatprep.mubr.bf16.mxu1 %v392_v23  ;;  %3697 = vtanh.f32 %v329_v24 }
 0x108   :  { %v3680_v28 = vpop.eup %3679  ;;  %3337 = vmatmul.mubr.bf16.gmra.mrb[24].mxu1 %v393_v19 }
 0x109   :  { %v3682_v29 = vpop.eup %3681  ;;  %v401_v30 = vpack.c.bf16 %v3680_v28, %v3676_v25 }
 0x10a   :  { %v3684_v31 = vpop.eup %3683 }
 0x10b   :  { %v3686_v32 = vpop.eup %3685 }
 0x10c   :  { %v3688_v33 = vpop.eup %3687  ;;  %v395_v34 = vpack.c.bf16 %v3686_v32, %v3682_v29 }
 0x10d   :  { %v3690_v36 = vpop.eup %3689  ;;  %v394_v37 = vpack.c.bf16 %v3688_v33, %v3684_v31 }
 0x10e   :  { %v3692_v38 = vpop.eup %3691  ;;  %v400_v39 = vpack.c.bf16 %v3690_v36, %v3678_v27 }
 0x10f   :  { %v3694_v40 = vpop.eup %3693  ;;  %3340 = vmatprep.mubr.bf16.mxu1 %v394_v37 }
 0x110   :  { %v3696_v58 = vpop.eup %3695  ;;  %3341 = vmatmul.mubr.bf16.gmra.mrb[28].mxu1 %v395_v34 }
 0x111   :  { %v3698_v41 = vpop.eup %3697  ;;  %3344 = vmatprep.mubr.bf16.mxu1 %v396_v2  ;;  %v403_v43 = vpack.c.bf16 %v3696_v58, %v3692_v38 }
 0x112   :  { %v402_v44 = vpack.c.bf16 %v3698_v41, %v3694_v40 }
 0x118   :  { %3345 = vmatmul.mubr.bf16.gmra.mrb[32].mxu1 %v397_v46 }
 0x119   :  { %3348 = vmatprep.mubr.bf16.mxu1 %v398_v26 }
 0x120   :  { %3349 = vmatmul.mubr.bf16.gmra.mrb[36].mxu1 %v399_v11 }
 0x121   :  { %3352 = vmatprep.mubr.bf16.mxu1 %v400_v39 }
 0x128   :  { %3353 = vmatmul.mubr.bf16.gmra.mrb[40].mxu1 %v401_v30 }
 0x129   :  { %3356 = vmatprep.mubr.bf16.mxu1 %v402_v44 }
 0x130   :  { %3357 = vmatmul.mubr.bf16.gmra.mrb[44].mxu1 %v403_v43 }
 0x1cb   :  { %v3330_v47 = vpop.f32.mrb[16].mxu1 }
 0x1cc   :  { %v502_v48 = vadd.f32 %v3330_v47, %v4216_v45  ;;  %v493_v49 = vpop.f32.mrb[17].mxu1 }
 0x1cd   :  { %v494_v50 = vadd.f32 %v4216_v45, %v493_v49  ;;  %v3331_v51 = vpop.f32.mrb[18].mxu1 }
 0x1ce   :  { %3699 = vtanh.f32 %v502_v48  ;;  %v496_v35 = vpop.f32.mrb[19].mxu1  ;;  %v505_v42 = vadd.f32 %v3331_v51, %v4216_v45 }
 0x1cf   :  { %3701 = vtanh.f32 %v494_v50  ;;  %v497_v52 = vadd.f32 %v4216_v45, %v496_v35 }
 0x1d0   :  { %3703 = vtanh.f32 %v505_v42 }
 0x1d1   :  { %3705 = vtanh.f32 %v497_v52 }
 0x1d3   :  { %v3334_v46 = vpop.f32.mrb[20].mxu1 }
 0x1d4   :  { %v509_v53 = vpop.f32.mrb[21].mxu1  ;;  %v518_v57 = vadd.f32 %v3334_v46, %v4216_v45 }
 0x1d5   :  { %v3335_v54 = vpop.f32.mrb[22].mxu1  ;;  %v510_v61 = vadd.f32 %v4216_v45, %v509_v53 }
 0x1d6   :  { %v512_v55 = vpop.f32.mrb[23].mxu1  ;;  %3707 = vtanh.f32 %v518_v57  ;;  %v521_v6 = vadd.f32 %v3335_v54, %v4216_v45 }
 0x1d7   :  { %v513_v10 = vadd.f32 %v4216_v45, %v512_v55 }
 0x1d8   :  { %v3700_v56 = vpop.eup %3699 }
 0x1d9   :  { %v659_v59 = vsel %vm652_vm2, %v3700_v56, 0.0  ;;  %v3702_v60 = vpop.eup %3701 }
 0x1da   :  { %660 = vadd.xlane.f32.xlu0 %v659_v59  ;;  %v653_v3 = vsel %vm652_vm2, %v3702_v60, 0.0  ;;  %v3704_v4 = vpop.eup %3703 }
 0x1db   :  { %v3338_v62 = vpop.f32.mrb[24].mxu1  ;;  %v662_v8 = vsel %vm652_vm2, %v3704_v4, 0.0  ;;  %v3706_v9 = vpop.eup %3705 }
 0x1dc   :  { %v534_v63 = vadd.f32 %v3338_v62, %v4216_v45  ;;  %v525_v0 = vpop.f32.mrb[25].mxu1  ;;  %v656_v15 = vsel %vm652_vm2, %v3706_v9, 0.0 }
 0x1dd   :  { %v526_v1 = vadd.f32 %v4216_v45, %v525_v0  ;;  %v3339_v2 = vpop.f32.mrb[26].mxu1 }
 0x1de   :  { %3709 = vtanh.f32 %v534_v63  ;;  %v528_v5 = vpop.f32.mrb[27].mxu1  ;;  %654 = vadd.xlane.f32.xlu0 %v653_v3  ;;  %v537_v7 = vadd.f32 %v3339_v2, %v4216_v45 }
 0x1df   :  { %3711 = vtanh.f32 %v510_v61  ;;  %v529_v12 = vadd.f32 %v4216_v45, %v528_v5 }
 0x1e0   :  { %3713 = vtanh.f32 %v526_v1  ;;  %v3708_v16 = vpop.eup %3707 }
 0x1e1   :  { %3715 = vtanh.f32 %v521_v6  ;;  %v671_v22 = vsel %vm652_vm2, %v3708_v16, 0.0 }
 0x1e2   :  { %663 = vadd.xlane.f32.xlu0 %v662_v8  ;;  %3717 = vtanh.f32 %v537_v7 }
 0x1e3   :  { %v3342_v11 = vpop.f32.mrb[28].mxu1  ;;  %3719 = vtanh.f32 %v513_v10 }
 0x1e4   :  { %v541_v13 = vpop.f32.mrb[29].mxu1  ;;  %3721 = vtanh.f32 %v529_v12  ;;  %v550_v19 = vadd.f32 %v3342_v11, %v4216_v45 }
 0x1e5   :  { %v3343_v14 = vpop.f32.mrb[30].mxu1  ;;  %v542_v24 = vadd.f32 %v4216_v45, %v541_v13 }
 0x1e6   :  { %v544_v17 = vpop.f32.mrb[31].mxu1  ;;  %657 = vadd.xlane.f32.xlu0 %v656_v15  ;;  %3723 = vtanh.f32 %v550_v19  ;;  %v553_v36 = vadd.f32 %v3343_v14, %v4216_v45 }
 0x1e7   :  { %v545_v41 = vadd.f32 %v4216_v45, %v544_v17 }
 0x1e8   :  { %v3710_v18 = vpop.eup %3709 }
 0x1e9   :  { %v3712_v20 = vpop.eup %3711  ;;  %v683_v21 = vsel %vm652_vm2, %v3710_v18, 0.0 }
 0x1ea   :  { %v3714_v23 = vpop.eup %3713  ;;  %684 = vadd.xlane.f32.xlu1 %v683_v21  ;;  %672 = vadd.xlane.f32.xlu0 %v671_v22  ;;  %v665_v32 = vsel %vm652_vm2, %v3712_v20, 0.0 }
 0x1eb   :  { %v3346_v25 = vpop.f32.mrb[32].mxu1  ;;  %v3716_v28 = vpop.eup %3715  ;;  %v677_v31 = vsel %vm652_vm2, %v3714_v23, 0.0 }
 0x1ec   :  { %v566_v26 = vadd.f32 %v3346_v25, %v4216_v45  ;;  %v557_v27 = vpop.f32.mrb[33].mxu1  ;;  %v3718_v33 = vpop.eup %3717  ;;  %v674_v40 = vsel %vm652_vm2, %v3716_v28, 0.0 }
 0x1ed   :  { %v558_v29 = vadd.f32 %v4216_v45, %v557_v27  ;;  %v3347_v30 = vpop.f32.mrb[34].mxu1  ;;  %v3720_v38 = vpop.eup %3719  ;;  %v686_v39 = vsel %vm652_vm2, %v3718_v33, 0.0 }
 0x1ee   :  { %3725 = vtanh.f32 %v566_v26  ;;  %v560_v34 = vpop.f32.mrb[35].mxu1  ;;  %678 = vadd.xlane.f32.xlu1 %v677_v31  ;;  %666 = vadd.xlane.f32.xlu0 %v665_v32  ;;  %v569_v37 = vadd.f32 %v3347_v30, %v4216_v45  ;;  %v3722_v58 = vpop.eup %3721  ;;  %v668_v50 = vsel %vm652_vm2, %v3720_v38, 0.0 }
 0x1ef   :  { %3727 = vtanh.f32 %v542_v24  ;;  %v680_v49 = vsel %vm652_vm2, %v3722_v58, 0.0  ;;  %v561_v42 = vadd.f32 %v4216_v45, %v560_v34 }
 0x1f0   :  { %3729 = vtanh.f32 %v558_v29  ;;  %v3724_v51 = vpop.eup %3723 }
 0x1f1   :  { %3731 = vtanh.f32 %v553_v36  ;;  %v695_v54 = vsel %vm652_vm2, %v3724_v51, 0.0  ;;  %v4288_v51 = vld [vmem:[%s4740_s10] sm:$0x3] }
 0x1f2   :  { %687 = vadd.xlane.f32.xlu1 %v686_v39  ;;  %675 = vadd.xlane.f32.xlu0 %v674_v40  ;;  %3733 = vtanh.f32 %v569_v37 }
 0x1f3   :  { %v3350_v43 = vpop.f32.mrb[36].mxu1  ;;  %3735 = vtanh.f32 %v545_v41 }
 0x1f4   :  { %v573_v44 = vpop.f32.mrb[37].mxu1  ;;  %v582_v4 = vadd.f32 %v3350_v43, %v4216_v45 }
 0x1f5   :  { %v574_v47 = vadd.f32 %v4216_v45, %v573_v44  ;;  %v3351_v48 = vpop.f32.mrb[38].mxu1 }
 0x1f6   :  { %v576_v35 = vpop.f32.mrb[39].mxu1  ;;  %681 = vadd.xlane.f32.xlu1 %v680_v49  ;;  %669 = vadd.xlane.f32.xlu0 %v668_v50  ;;  %v585_v10 = vadd.f32 %v3351_v48, %v4216_v45 }
 0x1f7   :  { %3737 = vtanh.f32 %v574_v47  ;;  %v577_v52 = vadd.f32 %v4216_v45, %v576_v35  ;;  %v749_v47 = vld [vmem:[%s4764_s30] sm:$0xff] }
 0x1f8   :  { %v3726_v46 = vpop.eup %3725  ;;  %3739 = vtanh.f32 %v561_v42  ;;  %v782_v48 = vpack.c.bf16 %v749_v47, %v749_v47  ;;  %v3569_v35 = vld [vmem:[%s4742_s12] sm:$0xff]   ;;  %v3570_v42 = vld [vmem:[%s4742_s12 + $0x8] sm:$0xff]  }
 0x1f9   :  { %v3728_v53 = vpop.eup %3727  ;;  %v707_v55 = vsel %vm652_vm2, %v3726_v46, 0.0  ;;  %3741 = vtanh.f32 %v577_v52  ;;  %3372 = vmatprep.subr.bf16.mxu1 %v3569_v35  ;;  %v3571_v46 = vld [vmem:[%s4742_s12 + $0x10] sm:$0xff]   ;;  %v3572_v52 = vld [vmem:[%s4742_s12 + $0x18] sm:$0xff]  }
 0x1fa   :  { %v3730_v56 = vpop.eup %3729  ;;  %696 = vadd.xlane.f32.xlu1 %v695_v54  ;;  %708 = vadd.xlane.f32.xlu0 %v707_v55  ;;  %v689_v0 = vsel %vm652_vm2, %v3728_v53, 0.0  ;;  %v1023_v50 = vsel %vm1021_vm3, %v782_v48, 0  ;;  %v3573_v53 = vld [vmem:[%s4742_s12 + $0x20] sm:$0xff]  }
 0x1fb   :  { %v3354_v57 = vpop.f32.mrb[40].mxu1  ;;  %v3732_v61 = vpop.eup %3731  ;;  %v701_v1 = vsel %vm652_vm2, %v3730_v56, 0.0  ;;  %3552 = vmatprep.subr.msk.bf16.mxu0 %vm1021_vm3, %v782_v48  ;;  %3373 = vmatpush3.bf16.msra.mxu1 %v3569_v35 }
 0x1fc   :  { %v598_v59 = vadd.f32 %v3354_v57, %v4216_v45  ;;  %v589_v60 = vpop.f32.mrb[41].mxu1  ;;  %v3734_v2 = vpop.eup %3733  ;;  %v698_v7 = vsel %vm652_vm2, %v3732_v61, 0.0  ;;  %3361 = vmatpush3.bf16.msra.mxu0 %v1023_v50  ;;  %3374 = vmatprep.subr.bf16.mxu1 %v3570_v42 }
 0x1fd   :  { %v590_v62 = vadd.f32 %v4216_v45, %v589_v60  ;;  %v3355_v63 = vpop.f32.mrb[42].mxu1  ;;  %v3736_v6 = vpop.eup %3735  ;;  %v710_v8 = vsel %vm652_vm2, %v3734_v2, 0.0  ;;  %3553 = vmatprep.subr.msk.bf16.mxu0 %vm175_vm0, %v4288_v51 }
 0x1fe   :  { %v592_v3 = vpop.f32.mrb[43].mxu1  ;;  %690 = vadd.xlane.f32.xlu1 %v689_v0  ;;  %702 = vadd.xlane.f32.xlu0 %v701_v1  ;;  %3743 = vtanh.f32 %v598_v59  ;;  %v601_v5 = vadd.f32 %v3355_v63, %v4216_v45  ;;  %v692_v18 = vsel %vm652_vm2, %v3736_v6, 0.0  ;;  %v847_v1 = vlaneseq }
 0x1ff   :  { %3745 = vtanh.f32 %v590_v62  ;;  %v593_v12 = vadd.f32 %v4216_v45, %v592_v3  ;;  %3375 = vmatpush3.bf16.msra.mxu1 %v3570_v42 }
 0x200   :  { %3747 = vtanh.f32 %v582_v4  ;;  %3376 = vmatprep.subr.bf16.mxu1 %v3571_v46  ;;  %v4309_v6 = vshrl.u32 %v847_v1, 7 }
 0x201   :  { %v3738_v9 = vpop.eup %3737  ;;  %3749 = vtanh.f32 %v601_v5  ;;  %v848_v5 = vand.u32 127, %v847_v1 }
 0x202   :  { %699 = vadd.xlane.f32.xlu1 %v698_v7  ;;  %711 = vadd.xlane.f32.xlu0 %v710_v8  ;;  %v3740_v15 = vpop.eup %3739  ;;  %v713_v19 = vsel %vm652_vm2, %v3738_v9, 0.0  ;;  %3751 = vtanh.f32 %v585_v10 }
 0x203   :  { %v3358_v11 = vpop.f32.mrb[44].mxu1  ;;  %v3742_v20 = vpop.eup %3741  ;;  %3753 = vtanh.f32 %v593_v12  ;;  %v704_v25 = vsel %vm652_vm2, %v3740_v15, 0.0  ;;  %3377 = vmatpush3.bf16.msra.mxu1 %v3571_v46 }
 0x204   :  { %v614_v13 = vadd.f32 %v3358_v11, %v4216_v45  ;;  %v605_v14 = vpop.f32.mrb[45].mxu1  ;;  %v716_v26 = vsel %vm652_vm2, %v3742_v20, 0.0  ;;  %3378 = vmatprep.subr.bf16.mxu1 %v3572_v52 }
 0x205   :  { %v606_v16 = vadd.f32 %v4216_v45, %v605_v14  ;;  %v3359_v17 = vpop.f32.mrb[46].mxu1  ;;  %v4314_v14 = vsub.s32 %v848_v5, %v4309_v6 }
 0x206   :  { %v617_v21 = vadd.f32 %v3359_v17, %v4216_v45  ;;  %693 = vadd.xlane.f32.xlu1 %v692_v18  ;;  %714 = vadd.xlane.f32.xlu0 %v713_v19  ;;  %v608_v22 = vpop.f32.mrb[47].mxu1  ;;  %3755 = vtanh.f32 %v614_v13 }
 0x207   :  { %v609_v23 = vadd.f32 %v4216_v45, %v608_v22  ;;  %3757 = vtanh.f32 %v606_v16  ;;  %3379 = vmatpush3.bf16.msra.mxu1 %v3572_v52 }
 0x208   :  { %v3744_v24 = vpop.eup %3743  ;;  %3380 = vmatprep.subr.bf16.mxu1 %v3573_v53 }
 0x209   :  { %v3746_v27 = vpop.eup %3745  ;;  %v731_v29 = vsel %vm652_vm2, %v3744_v24, 0.0  ;;  %3759 = vtanh.f32 %v609_v23 }
 0x20a   :  { %705 = vadd.xlane.f32.xlu1 %v704_v25  ;;  %717 = vadd.xlane.f32.xlu0 %v716_v26  ;;  %v3748_v28 = vpop.eup %3747  ;;  %v725_v30 = vsel %vm652_vm2, %v3746_v27, 0.0  ;;  %3761 = vtanh.f32 %v617_v21 }
 0x20b   :  { %v3750_v31 = vpop.eup %3749  ;;  %v719_v33 = vsel %vm652_vm2, %v3748_v28, 0.0  ;;  %3381 = vmatpush3.bf16.msra.mxu1 %v3573_v53 }
 0x20c   :  { %v3752_v45 = vpop.eup %3751  ;;  %v734_v32 = vsel %vm652_vm2, %v3750_v31, 0.0 }
 0x20d   :  { %v3754_v34 = vpop.eup %3753  ;;  %v722_v37 = vsel %vm652_vm2, %v3752_v45, 0.0 }
 0x20e   :  { %732 = vadd.xlane.f32.xlu1 %v731_v29  ;;  %726 = vadd.xlane.f32.xlu0 %v725_v30  ;;  %v728_v36 = vsel %vm652_vm2, %v3754_v34, 0.0 }
 0x210   :  { %v3756_v38 = vpop.eup %3755 }
 0x211   :  { %v743_v39 = vsel %vm652_vm2, %v3756_v38, 0.0  ;;  %v3758_v40 = vpop.eup %3757 }
 0x212   :  { %735 = vadd.xlane.f32.xlu1 %v734_v32  ;;  %720 = vadd.xlane.f32.xlu0 %v719_v33  ;;  %v737_v58 = vsel %vm652_vm2, %v3758_v40, 0.0 }
 0x213   :  { %v3760_v41 = vpop.eup %3759 }
 0x214   :  { %v740_v43 = vsel %vm652_vm2, %v3760_v41, 0.0  ;;  %v3762_v44 = vpop.eup %3761 }
 0x215   :  { %v746_v49 = vsel %vm652_vm2, %v3762_v44, 0.0 }
 0x216   :  { %729 = vadd.xlane.f32.xlu1 %v728_v36  ;;  %723 = vadd.xlane.f32.xlu0 %v722_v37 }
 0x21a   :  { %744 = vadd.xlane.f32.xlu1 %v743_v39 }
 0x21e   :  { %738 = vadd.xlane.f32.xlu1 %v737_v58 }
 0x222   :  { %741 = vadd.xlane.f32.xlu1 %v740_v43 }
 0x226   :  { %747 = vadd.xlane.f32.xlu1 %v746_v49 }
 0x267   :  { %v661_v54 = vpop.xlane.xlu0 %660 }
 0x268   :  { %v752_v12 = vpack.c.bf16 %v661_v54, %v661_v54 }
 0x26a   :  { %v817_v24 = vunpack.c.l.b16 %v752_v12 }
 0x26b   :  { %v655_v55 = vpop.xlane.xlu0 %654 }
 0x26c   :  { %v750_v7 = vpack.c.bf16 %v655_v55, %v655_v55  ;;  %v860_v37 = vrot.slane %v817_v24, %v4314_v14 }
 0x26e   :  { %v815_v15 = vunpack.c.l.b16 %v750_v7 }
 0x26f   :  { %v664_v56 = vpop.xlane.xlu0 %663 }
 0x270   :  { %v753_v16 = vpack.c.bf16 %v664_v56, %v664_v56  ;;  %v852_v26 = vrot.slane %v815_v15, %v4314_v14 }
 0x272   :  { %v818_v27 = vunpack.c.l.b16 %v753_v16 }
 0x273   :  { %v658_v57 = vpop.xlane.xlu0 %657 }
 0x274   :  { %v751_v2 = vpack.c.bf16 %v658_v57, %v658_v57  ;;  %v864_v40 = vrot.slane %v818_v27, %v4314_v14 }
 0x276   :  { %v816_v9 = vunpack.c.l.b16 %v751_v2 }
 0x277   :  { %v685_v59 = vpop.xlane.xlu1 %684  ;;  %v673_v60 = vpop.xlane.xlu0 %672 }
 0x278   :  { %v856_v19 = vrot.slane %v816_v9, %v4314_v14  ;;  %v760_v20 = vpack.c.bf16 %v685_v59, %v685_v59  ;;  %v756_v38 = vpack.c.bf16 %v673_v60, %v673_v60 }
 0x27a   :  { %v978_v45 = vsel %vm977_vm4, %v856_v19, %v852_v26  ;;  %v825_v32 = vunpack.c.l.b16 %v760_v20  ;;  %v821_v53 = vunpack.c.l.b16 %v756_v38 }
 0x27b   :  { %v679_v61 = vpop.xlane.xlu1 %678  ;;  %v667_v62 = vpop.xlane.xlu0 %666  ;;  %v980_v43 = vsel %vm979_vm5, %v860_v37, %v978_v45 }
 0x27c   :  { %v758_v13 = vpack.c.bf16 %v679_v61, %v679_v61  ;;  %v754_v17 = vpack.c.bf16 %v667_v62, %v667_v62  ;;  %v892_v49 = vrot.slane %v825_v32, %v4314_v14  ;;  %v982_v55 = vsel %vm981_vm6, %v864_v40, %v980_v43 }
 0x27e   :  { %v823_v25 = vunpack.c.l.b16 %v758_v13  ;;  %v819_v29 = vunpack.c.l.b16 %v754_v17 }
 0x27f   :  { %v688_v63 = vpop.xlane.xlu1 %687  ;;  %v4307_v0 = vpop.xlane.xlu0 %675 }
 0x280   :  { %v761_v30 = vpack.c.bf16 %v688_v63, %v688_v63  ;;  %v884_v39 = vrot.slane %v823_v25, %v4314_v14  ;;  %v868_v44 = vrot.slane %v819_v29, %v4314_v14  ;;  %v757_v50 = vpack.c.bf16 %v4307_v0, %v4307_v0 }
 0x282   :  { %v826_v47 = vunpack.c.l.b16 %v761_v30  ;;  %v984_v60 = vsel %vm983_vm7, %v868_v44, %v982_v55  ;;  %v822_v63 = vunpack.c.l.b16 %v757_v50 }
 0x283   :  { %v682_v3 = vpop.xlane.xlu1 %681  ;;  %v670_v4 = vpop.xlane.xlu0 %669 }
 0x284   :  { %v759_v8 = vpack.c.bf16 %v682_v3, %v682_v3  ;;  %v755_v21 = vpack.c.bf16 %v670_v4, %v670_v4  ;;  %v896_v61 = vrot.slane %v826_v47, %v4314_v14  ;;  %v876_v3 = vrot.slane %v821_v53, %v4314_v14 }
 0x285   :  { %v880_v13 = vrot.slane %v822_v63, %v4314_v14 }
 0x286   :  { %v824_v18 = vunpack.c.l.b16 %v759_v8  ;;  %v820_v33 = vunpack.c.l.b16 %v755_v21 }
 0x287   :  { %v697_v10 = vpop.xlane.xlu1 %696  ;;  %v4311_v11 = vpop.xlane.xlu0 %708 }
 0x288   :  { %v888_v31 = vrot.slane %v824_v18, %v4314_v14  ;;  %v764_v58 = vpack.c.bf16 %v697_v10, %v697_v10  ;;  %v872_v35 = vrot.slane %v820_v33, %v4314_v14  ;;  %v768_v30 = vpack.c.bf16 %v4311_v11, %v4311_v11 }
 0x28a   :  { %v991_v48 = vsel %vm977_vm4, %v888_v31, %v884_v39  ;;  %v829_v57 = vunpack.c.l.b16 %v764_v58  ;;  %v986_v0 = vsel %vm985_vm8, %v872_v35, %v984_v60  ;;  %v833_v40 = vunpack.c.l.b16 %v768_v30 }
 0x28b   :  { %v691_v22 = vpop.xlane.xlu1 %690  ;;  %v4317_v23 = vpop.xlane.xlu0 %702  ;;  %v992_v56 = vsel %vm979_vm5, %v892_v49, %v991_v48  ;;  %v988_v10 = vsel %vm987_vm9, %v876_v3, %v986_v0 }
 0x28c   :  { %v762_v28 = vpack.c.bf16 %v691_v22, %v691_v22  ;;  %v993_v4 = vsel %vm981_vm6, %v896_v61, %v992_v56  ;;  %v908_v7 = vrot.slane %v829_v57, %v4314_v14  ;;  %v990_v18 = vsel %vm989_vm10, %v880_v13, %v988_v10 }
 0x28d   :  { %v766_v25 = vpack.c.bf16 %v4317_v23, %v4317_v23  ;;  %v924_v35 = vrot.slane %v833_v40, %v4314_v14  ;;  %v3575_v40 = vld [vmem:[%s4742_s12 + $0x30] sm:$0xff]  }
 0x28e   :  { %v827_v41 = vunpack.c.l.b16 %v762_v28 }
 0x28f   :  { %v700_v34 = vpop.xlane.xlu1 %699  ;;  %v4322_v36 = vpop.xlane.xlu0 %711  ;;  %v831_v45 = vunpack.c.l.b16 %v766_v25 }
 0x290   :  { %v765_v42 = vpack.c.bf16 %v700_v34, %v700_v34  ;;  %v900_v59 = vrot.slane %v827_v41, %v4314_v14  ;;  %v769_v37 = vpack.c.bf16 %v4322_v36, %v4322_v36 }
 0x291   :  { %v916_v23 = vrot.slane %v831_v45, %v4314_v14 }
 0x292   :  { %v830_v1 = vunpack.c.l.b16 %v765_v42  ;;  %v994_v8 = vsel %vm983_vm7, %v900_v59, %v993_v4  ;;  %v834_v48 = vunpack.c.l.b16 %v769_v37  ;;  %v1103_v37 = vsel %vm175_vm0, %v4288_v51, 0  ;;  %v3574_v51 = vld [vmem:[%s4742_s12 + $0x28] sm:$0xff]  }
 0x293   :  { %v694_v46 = vpop.xlane.xlu1 %693  ;;  %v4334_v52 = vpop.xlane.xlu0 %714  ;;  %3382 = vmatprep.subr.bf16.mxu1 %v3574_v51 }
 0x294   :  { %v763_v54 = vpack.c.bf16 %v694_v46, %v694_v46  ;;  %v912_v15 = vrot.slane %v830_v1, %v4314_v14  ;;  %v770_v11 = vpack.c.bf16 %v4334_v52, %v4334_v52  ;;  %3383 = vmatpush3.bf16.msra.mxu1 %v3574_v51 }
 0x295   :  { %3384 = vmatprep.subr.bf16.mxu1 %v3575_v40 }
 0x296   :  { %v828_v62 = vunpack.c.l.b16 %v763_v54  ;;  %v835_v57 = vunpack.c.l.b16 %v770_v11  ;;  %v1077_v11 = vld [vmem:[%s4766_s26 + $0x18] sm:$0xff] }
 0x297   :  { %v706_v2 = vpop.xlane.xlu1 %705  ;;  %v718_v9 = vpop.xlane.xlu0 %717 }
 0x298   :  { %v904_v5 = vrot.slane %v828_v62, %v4314_v14  ;;  %v767_v24 = vpack.c.bf16 %v706_v2, %v706_v2  ;;  %v771_v42 = vpack.c.bf16 %v718_v9, %v718_v9  ;;  %v928_v62 = vrot.slane %v834_v48, %v4314_v14  ;;  %3385 = vmatpush3.bf16.msra.mxu1 %v3575_v40 }
 0x299   :  { %v932_v9 = vrot.slane %v835_v57, %v4314_v14 }
 0x29a   :  { %v995_v12 = vsel %vm985_vm8, %v904_v5, %v994_v8  ;;  %v832_v27 = vunpack.c.l.b16 %v767_v24  ;;  %v836_v0 = vunpack.c.l.b16 %v771_v42 }
 0x29b   :  { %v996_v16 = vsel %vm987_vm9, %v908_v7, %v995_v12  ;;  %v733_v17 = vpop.xlane.xlu1 %732  ;;  %v727_v21 = vpop.xlane.xlu0 %726 }
 0x29c   :  { %v997_v19 = vsel %vm989_vm10, %v912_v15, %v996_v16  ;;  %v774_v28 = vpack.c.bf16 %v727_v21, %v727_v21  ;;  %v776_v33 = vpack.c.bf16 %v733_v17, %v733_v17  ;;  %v920_v38 = vrot.slane %v832_v27, %v4314_v14  ;;  %v1083_v27 = vld [vmem:[%s4765_s4 + $0x8] sm:$0xff] }
 0x29d   :  { %v1012_v20 = vpack.c.b16 %v997_v19, %v990_v18 }
 0x29e   :  { %v839_v39 = vunpack.c.l.b16 %v774_v28  ;;  %v841_v43 = vunpack.c.l.b16 %v776_v33  ;;  %v998_v49 = vsel %vm977_vm4, %v920_v38, %v916_v23  ;;  %v1085_v38 = vld [vmem:[%s4765_s4 + $0x18] sm:$0xff] }
 0x29f   :  { %v736_v22 = vpop.xlane.xlu1 %735  ;;  %3362 = vmatprep.mubr.msk.bf16.mxu0 %vm1014_vm11, %v1012_v20  ;;  %v721_v31 = vpop.xlane.xlu0 %720  ;;  %v999_v52 = vsel %vm979_vm5, %v924_v35, %v998_v49  ;;  %v936_v20 = vrot.slane %v836_v0, %v4314_v14  ;;  %v3576_v23 = vld [vmem:[%s4742_s12 + $0x38] sm:$0xff]  }
 0x2a0   :  { %v777_v58 = vpack.c.bf16 %v736_v22, %v736_v22  ;;  %v948_v36 = vrot.slane %v839_v39, %v4314_v14  ;;  %v772_v46 = vpack.c.bf16 %v721_v31, %v721_v31  ;;  %v956_v59 = vrot.slane %v841_v43, %v4314_v14  ;;  %3386 = vmatprep.subr.bf16.mxu1 %v3576_v23 }
 0x2a1   :  { %v1000_v4 = vsel %vm981_vm6, %v928_v62, %v999_v52  ;;  %3387 = vmatpush3.bf16.msra.mxu1 %v3576_v23 }
 0x2a2   :  { %v842_v53 = vunpack.c.l.b16 %v777_v58  ;;  %v837_v1 = vunpack.c.l.b16 %v772_v46  ;;  %v1001_v17 = vsel %vm983_vm7, %v932_v9, %v1000_v4 }
 0x2a3   :  { %v730_v26 = vpop.xlane.xlu1 %729  ;;  %v724_v44 = vpop.xlane.xlu0 %723  ;;  %v1002_v28 = vsel %vm985_vm8, %v936_v20, %v1001_v17 }
 0x2a4   :  { %v775_v29 = vpack.c.bf16 %v730_v26, %v730_v26  ;;  %v773_v55 = vpack.c.bf16 %v724_v44, %v724_v44  ;;  %v960_v5 = vrot.slane %v842_v53, %v4314_v14  ;;  %v940_v18 = vrot.slane %v837_v1, %v4314_v14  ;;  %v1082_v26 = vld [vmem:[%s4765_s4] sm:$0xff] }
 0x2a5   :  { %v1087_v33 = vpack.c.bf16 %v1083_v27, %v1082_v26  ;;  %v1074_v44 = vld [vmem:[%s4766_s26] sm:$0xff]  ;;  %v1285_v27 = vld [vmem:[%s4767_s1 + $0x8] sm:$0xff] }
 0x2a6   :  { %v840_v32 = vunpack.c.l.b16 %v775_v29  ;;  %v838_v7 = vunpack.c.l.b16 %v773_v55  ;;  %v1003_v30 = vsel %vm987_vm9, %v940_v18, %v1002_v28  ;;  %v1284_v26 = vld [vmem:[%s4767_s1] sm:$0xff] }
 0x2a7   :  { %v745_v34 = vpop.xlane.xlu1 %744  ;;  %v4461_v28 = vpack.c.bf16 %v1285_v27, %v1284_v26  ;;  %v3591_v26 = vld [vmem:[%s4747_s17] ss:$8 sps:$4 sm:$0xff]   ;;  %v3596_v27 = vld [vmem:[%s4747_s17 + $0x14] ss:$8 sps:$4 sm:$0xff]  }
 0x2a8   :  { %v952_v41 = vrot.slane %v840_v32, %v4314_v14  ;;  %v780_v60 = vpack.c.bf16 %v745_v34, %v745_v34  ;;  %v944_v21 = vrot.slane %v838_v7, %v4314_v14  ;;  %v3578_v7 = vld [vmem:[%s4744_s14 + $0x8] sm:$0xff]  }
 0x2aa   :  { %v1005_v54 = vsel %vm977_vm4, %v952_v41, %v948_v36  ;;  %v845_v10 = vunpack.c.l.b16 %v780_v60  ;;  %v1004_v45 = vsel %vm989_vm10, %v944_v21, %v1003_v30  ;;  %v1076_v41 = vld [vmem:[%s4766_s26 + $0x10] sm:$0xff] }
 0x2ab   :  { %v739_v47 = vpop.xlane.xlu1 %738  ;;  %v1006_v2 = vsel %vm979_vm5, %v956_v59, %v1005_v54  ;;  %v3003_v54 = vld [vmem:[%s4741_s11] ss:$0 sm:$0xff] }
 0x2ac   :  { %v778_v50 = vpack.c.bf16 %v739_v47, %v739_v47  ;;  %v1007_v13 = vsel %vm981_vm6, %v960_v5, %v1006_v2  ;;  %v972_v25 = vrot.slane %v845_v10, %v4314_v14  ;;  %v1075_v47 = vld [vmem:[%s4766_s26 + $0x8] sm:$0xff]  ;;  %v3577_v5 = vld [vmem:[%s4744_s14] sm:$0xff]  }
 0x2ae   :  { %v843_v56 = vunpack.c.l.b16 %v778_v50 }
 0x2af   :  { %v742_v61 = vpop.xlane.xlu1 %741 }
 0x2b0   :  { %v779_v63 = vpack.c.bf16 %v742_v61, %v742_v61  ;;  %v964_v3 = vrot.slane %v843_v56, %v4314_v14 }
 0x2b2   :  { %v844_v8 = vunpack.c.l.b16 %v779_v63  ;;  %v1008_v19 = vsel %vm983_vm7, %v964_v3, %v1007_v13 }
 0x2b3   :  { %v748_v12 = vpop.xlane.xlu1 %747 }
 0x2b4   :  { %v968_v15 = vrot.slane %v844_v8, %v4314_v14  ;;  %v781_v16 = vpack.c.bf16 %v748_v12, %v748_v12  ;;  %v3006_v8 = vld [vmem:[%s4743_s13] ss:$0 sm:$0xff]  ;;  %s2964_s13 = sshll.u32 %s3903_s22, 4  ;;  %s2965_s13 = int_to_ptr.vmem [resolvable:$true] %s2964_s13 }
 0x2b5   :  { %s3875_s23 = scalar_lea.vmem %s2965_s13, 512  ;;  %p3880_p1 = scmp.lt.s32.totalorder %s2965_s13, %s2965_s13 }
 0x2b6   :  { %v1009_v22 = vsel %vm985_vm8, %v968_v15, %v1008_v19  ;;  %v846_v24 = vunpack.c.l.b16 %v781_v16  ;;  %p3876_p0 = scmp.ne.s32.totalorder %s2965_s13, %s3875_s23  ;;  %p3881_p2 = scmp.lt.s32.totalorder %s3875_s23, %s3875_s23 }
 0x2b7   :  { %v1010_v31 = vsel %vm987_vm9, %v972_v25, %v1009_v22 }
 0x2b8   :  { %v976_v29 = vrot.slane %v846_v24, %v4314_v14  ;;  %v1084_v14 = vld [vmem:[%s4765_s4 + $0x10] sm:$0xff]  ;;  %s3901_s4 = smov 32   ;;  %p3882_p3 = por %p3881_p2, %p3880_p1 }
 0x2b9   :  { %v1088_v39 = vpack.c.bf16 %v1085_v38, %v1084_v14 }
 0x2ba   :  { %v1011_v32 = vsel %vm989_vm10, %v976_v29, %v1010_v31  ;;  %p3883_p4 = pnand %p3882_p3, %p3876_p0 }
 0x2bb   :  { %v1013_v34 = vpack.c.b16 %v1011_v32, %v1004_v45 }
 0x2bd   :  { %3363 = vmatmul.mubr.msk.bf16.vlgmr.msra.gmra.mrb[16].mxu0 %vm1014_vm11, %v1013_v34  ;;  %v1286_v34 = vld [vmem:[%s4767_s1 + $0x10] sm:$0xff] }
 0x2be   :  { %3367 = vmatpush3.bf16.msra.mxu0 %v1103_v37  ;;  %3368 = vmatprep.mubr.msk.bf16.mxu0 %vm126_vm1, %v1087_v33  ;;  %v1287_v37 = vld [vmem:[%s4767_s1 + $0x18] sm:$0xff] }
 0x2bf   :  { %3392 = vmatprep.subr.bf16.mxu0 %v3577_v5  ;;  %v4471_v14 = vpack.c.bf16 %v1287_v37, %v1286_v34 }
 0x2c5   :  { %3369 = vmatmul.mubr.msk.bf16.vlgmr.msra.gmra.mrb[20].mxu0 %vm126_vm1, %v1088_v39 }
 0x2c6   :  { %3393 = vmatpush3.bf16.msra.mxu0 %v3577_v5  ;;  %v3031_v5 = vld [vmem:[%s4746_s16] ss:$0 sm:$0xff] }
 0x2c7   :  { %3394 = vmatprep.subr.bf16.mxu0 %v3578_v7 }
 0x2ca   :  { %3395 = vmatpush3.bf16.msra.mxu0 %v3578_v7 }
 0x390   :  { %v3364_v58 = vpop.f32.mrb[16].mxu0 }
 0x391   :  { %v1059_v43 = vpop.f32.mrb[17].mxu0  ;;  %v1080_v49 = vmul.f32 %v3364_v58, %v1076_v41 }
 0x392   :  { %v3365_v48 = vpop.f32.mrb[18].mxu0  ;;  %v1078_v35 = vmul.f32 %v1074_v44, %v1059_v43 }
 0x393   :  { %v1081_v36 = vmul.f32 %v3365_v48, %v1077_v11  ;;  %v1062_v50 = vpop.f32.mrb[19].mxu0  ;;  %v3580_v48 = vld [vmem:[%s4745_s15 + $0x18] sm:$0xff]  }
 0x394   :  { %v1079_v42 = vmul.f32 %v1075_v47, %v1062_v50  ;;  %v3579_v47 = vld [vmem:[%s4745_s15 + $0x10] sm:$0xff]  }
 0x395   :  { %v4431_v46 = vpack.c.bf16 %v1081_v36, %v1080_v49  ;;  %3416 = vmatprep.subr.bf16.mxu1 %v3579_v47  ;;  %v3581_v49 = vld [vmem:[%s4745_s15] sm:$0xff]  }
 0x396   :  { %v4433_v53 = vpack.c.bf16 %v1079_v42, %v1078_v35 }
 0x398   :  { %v3370_v55 = vpop.f32.mrb[20].mxu0 }
 0x399   :  { %v1148_v56 = vadd.f32 %v3370_v55, %v3003_v54  ;;  %v1139_v57 = vpop.f32.mrb[21].mxu0 }
 0x39a   :  { %v1140_v52 = vadd.f32 %v3003_v54, %v1139_v57  ;;  %v3371_v59 = vpop.f32.mrb[22].mxu0 }
 0x39b   :  { %3763 = vtanh.f32 %v1148_v56  ;;  %v1151_v60 = vadd.f32 %v3371_v59, %v3003_v54  ;;  %v1142_v61 = vpop.f32.mrb[23].mxu0 }
 0x39c   :  { %3765 = vtanh.f32 %v1140_v52  ;;  %v1143_v62 = vadd.f32 %v3003_v54, %v1142_v61  ;;  %v3583_v61 = vld [vmem:[%s4747_s17 + $0x20] ss:$8 sps:$4 sm:$0xff]  }
 0x39d   :  { %3767 = vtanh.f32 %v1151_v60  ;;  %v3582_v60 = vld [vmem:[%s4745_s15 + $0x8] sm:$0xff]  }
 0x39e   :  { %3769 = vtanh.f32 %v1143_v62  ;;  %v3585_v62 = vld [vmem:[%s4747_s17 + $0x24] ss:$8 sps:$4 sm:$0xff]  }
 0x3a5   :  { %v3764_v63 = vpop.eup %3763 }
 0x3a6   :  { %v3766_v0 = vpop.eup %3765 }
 0x3a7   :  { %v3768_v1 = vpop.eup %3767 }
 0x3a8   :  { %v3770_v2 = vpop.eup %3769  ;;  %v1175_v3 = vpack.c.bf16 %v3768_v1, %v3764_v63  ;;  %v3586_v63 = vld [vmem:[%s4744_s14 + $0x10] sm:$0xff]   ;;  %v3590_v1 = vld [vmem:[%s4744_s14 + $0x18] sm:$0xff]  }
 0x3a9   :  { %v1174_v4 = vpack.c.bf16 %v3770_v2, %v3766_v0  ;;  %v3589_v0 = vld [vmem:[%s4747_s17 + $0x34] ss:$8 sps:$4 sm:$0xff]   ;;  %v3899_v2 = vmov 0  }
 0x3ab   :  { %3388 = vmatprep.mubr.bf16.mxu1 %v1174_v4  ;;  %v3593_v4 = vld [vmem:[%s4747_s17 + $0x4] ss:$8 sps:$4 sm:$0xff]  }
 0x3ac   :  { %3389 = vmatmul.mubr.bf16.vlgmr.msra.gmra.mrb[48].mxu1 %v1175_v3  ;;  %v3587_v3 = vld [vmem:[%s4747_s17 + $0x30] ss:$8 sps:$4 sm:$0xff]  }
 0x3ad   :  { %3417 = vmatpush3.bf16.msra.mxu1 %v3579_v47 }
 0x3ae   :  { %3418 = vmatprep.subr.bf16.mxu1 %v3580_v48 }
 0x3b1   :  { %3419 = vmatpush3.bf16.msra.mxu1 %v3580_v48 }
 0x3b2   :  { %3424 = vmatprep.subr.bf16.mxu1 %v3581_v49 }
 0x47f   :  { %v3390_v9 = vpop.f32.mrb[48].mxu1 }
 0x480   :  { %v1274_v10 = vadd.f32 %v3390_v9, %v3006_v8  ;;  %v1265_v12 = vpop.f32.mrb[49].mxu1 }
 0x481   :  { %v1266_v13 = vadd.f32 %v3006_v8, %v1265_v12  ;;  %v3391_v15 = vpop.f32.mrb[50].mxu1 }
 0x482   :  { %3771 = vtanh.f32 %v1274_v10  ;;  %v1277_v16 = vadd.f32 %v3391_v15, %v3006_v8  ;;  %v1268_v17 = vpop.f32.mrb[51].mxu1 }
 0x483   :  { %3773 = vtanh.f32 %v1266_v13  ;;  %v1269_v18 = vadd.f32 %v3006_v8, %v1268_v17 }
 0x484   :  { %3775 = vtanh.f32 %v1277_v16 }
 0x485   :  { %3777 = vtanh.f32 %v1269_v18 }
 0x48c   :  { %v3772_v19 = vpop.eup %3771 }
 0x48d   :  { %v3774_v20 = vpop.eup %3773 }
 0x48e   :  { %v3776_v21 = vpop.eup %3775 }
 0x48f   :  { %v3778_v22 = vpop.eup %3777  ;;  %v4447_v24 = vpack.c.bf16 %v3776_v21, %v3772_v19 }
 0x490   :  { %v4449_v25 = vpack.c.bf16 %v3778_v22, %v3774_v20 }
 0x492   :  { %3396 = vmatprep.mubr.msk.bf16.mxu0 %vm652_vm2, %v4449_v25 }
 0x493   :  { %3397 = vmatmul.mubr.msk.bf16.vlgmr.msra.gmra.mrb[24].mxu0 %vm652_vm2, %v4447_v24 }
 0x494   :  { %3404 = vmatprep.mubr.msk.bf16.mxu0 %vm652_vm2, %v4461_v28 }
 0x566   :  { %v3398_v29 = vpop.f32.mrb[24].mxu0 }
 0x567   :  { %v1362_v30 = vpop.f32.mrb[25].mxu0 }
 0x568   :  { %v3399_v31 = vpop.f32.mrb[26].mxu0 }
 0x569   :  { %v1380_v45 = vpack.c.bf16 %v3399_v31, %v3398_v29  ;;  %v1365_v32 = vpop.f32.mrb[27].mxu0  ;;  %v3594_v29 = vld [vmem:[%s4747_s17 + $0x10] ss:$8 sps:$4 sm:$0xff]  }
 0x56a   :  { %v1379_v33 = vpack.c.bf16 %v1365_v32, %v1362_v30 }
 0x56c   :  { %3400 = vmatprep.subr.bf16.mxu0 %v1379_v33 }
 0x56d   :  { %3401 = vmatpush3.bf16.msra.mxu0 %v1379_v33 }
 0x56e   :  { %3402 = vmatprep.subr.bf16.mxu0 %v1380_v45 }
 0x571   :  { %3403 = vmatpush3.bf16.msra.mxu0 %v1380_v45 }
 0x574   :  { %3405 = vmatmul.mubr.msk.bf16.vlgmr.msra.gmra.mrb[28].mxu0 %vm652_vm2, %v4471_v14 }
 0x575   :  { %3412 = vmatprep.mubr.msk.bf16.mxu0 %vm652_vm2, %v4433_v53 }
 0x647   :  { %v3406_v38 = vpop.f32.mrb[28].mxu0 }
 0x648   :  { %3779 = vtanh.f32 %v3406_v38  ;;  %v1421_v39 = vpop.f32.mrb[29].mxu0 }
 0x649   :  { %3781 = vtanh.f32 %v1421_v39  ;;  %v3407_v51 = vpop.f32.mrb[30].mxu0 }
 0x64a   :  { %3783 = vtanh.f32 %v3407_v51  ;;  %v1424_v40 = vpop.f32.mrb[31].mxu0 }
 0x64b   :  { %3785 = vtanh.f32 %v1424_v40 }
 0x652   :  { %v3780_v23 = vpop.eup %3779 }
 0x653   :  { %v3782_v58 = vpop.eup %3781 }
 0x654   :  { %v3784_v41 = vpop.eup %3783 }
 0x655   :  { %v3786_v11 = vpop.eup %3785  ;;  %v1443_v43 = vpack.c.bf16 %v3784_v41, %v3780_v23 }
 0x656   :  { %v1442_v44 = vpack.c.bf16 %v3786_v11, %v3782_v58  ;;  %v3597_v11 = vld [vmem:[%s4745_s15 + $0x30] sm:$0xff]  }
 0x658   :  { %3408 = vmatprep.subr.bf16.mxu0 %v1442_v44 }
 0x659   :  { %3409 = vmatpush3.bf16.msra.mxu0 %v1442_v44 }
 0x65a   :  { %3410 = vmatprep.subr.bf16.mxu0 %v1443_v43 }
 0x65d   :  { %3411 = vmatpush3.bf16.msra.mxu0 %v1443_v43 }
 0x65e   :  { %1690 = vmatprep.subr.bf16.mxu0 %v3585_v62  ;;  %v3608_v62 = vld [vmem:[%s4744_s14 + $0x28] sm:$0xff]  }
 0x660   :  { %3413 = vmatmul.mubr.msk.bf16.vlgmr.msra.gmra.mrb[32].mxu0 %vm652_vm2, %v4431_v46 }
 0x661   :  { %1722 = vmatprep.mubr.bf16.mxu0 %v3899_v2  ;;  %1691 = vmatpush1.bf16.msra.mxu0 %v3583_v61  ;;  %v3607_v61 = vld [vmem:[%s4747_s17 + $0x54] ss:$8 sps:$4 sm:$0xff]  }
 0x662   :  { %1692 = vmatprep.subr.bf16.mxu0 %v3589_v0  ;;  %v3073_v0 = vld [vmem:[%s4746_s16 + $0x1] ss:$0 sm:$0xff] }
 0x665   :  { %1693 = vmatpush1.bf16.msra.mxu0 %v3587_v3 }
 0x666   :  { %1763 = vmatprep.subr.bf16.mxu0 %v3593_v4 }
 0x733   :  { %v3414_v36 = vpop.f32.mrb[32].mxu0 }
 0x734   :  { %3787 = vtanh.f32 %v3414_v36  ;;  %v1484_v50 = vpop.f32.mrb[33].mxu0 }
 0x735   :  { %3789 = vtanh.f32 %v1484_v50  ;;  %v3415_v35 = vpop.f32.mrb[34].mxu0 }
 0x736   :  { %3791 = vtanh.f32 %v3415_v35  ;;  %v1487_v42 = vpop.f32.mrb[35].mxu0 }
 0x737   :  { %3793 = vtanh.f32 %v1487_v42 }
 0x73e   :  { %v3788_v54 = vpop.eup %3787 }
 0x73f   :  { %v3790_v55 = vpop.eup %3789 }
 0x740   :  { %v3792_v56 = vpop.eup %3791 }
 0x741   :  { %v3794_v57 = vpop.eup %3793  ;;  %v1512_v52 = vpack.c.bf16 %v3792_v56, %v3788_v54 }
 0x742   :  { %v1511_v59 = vpack.c.bf16 %v3794_v57, %v3790_v55  ;;  %v3600_v57 = vld [vmem:[%s4745_s15 + $0x28] sm:$0xff]  }
 0x744   :  { %3420 = vmatprep.mubr.msk.bf16.mxu1 %vm652_vm2, %v1511_v59  ;;  %v3603_v59 = vld [vmem:[%s4747_s17 + $0x44] ss:$8 sps:$4 sm:$0xff]  }
 0x745   :  { %3421 = vmatmul.mubr.msk.bf16.vlgmr.msra.gmra.mrb[52].mxu1 %vm652_vm2, %v1512_v52  ;;  %v3601_v52 = vld [vmem:[%s4747_s17 + $0x40] ss:$8 sps:$4 sm:$0xff]  }
 0x746   :  { %3425 = vmatpush3.bf16.msra.mxu1 %v3581_v49  ;;  %3428 = vmatprep.mubr.msk.bf16.mxu1 %vm652_vm2, %v1442_v44  ;;  %v3599_v44 = vld [vmem:[%s4745_s15 + $0x20] sm:$0xff]  }
 0x747   :  { %3426 = vmatprep.subr.bf16.mxu1 %v3582_v60 }
 0x74a   :  { %3427 = vmatpush3.bf16.msra.mxu1 %v3582_v60  ;;  %v3604_v60 = vld [vmem:[%s4744_s14 + $0x20] sm:$0xff]  }
 0x74b   :  { %3432 = vmatprep.subr.bf16.mxu1 %v3586_v63 }
 0x751   :  { %3429 = vmatmul.mubr.msk.bf16.vlgmr.msra.gmra.mrb[52].mxu1 %vm652_vm2, %v1443_v43  ;;  %v3598_v43 = vld [vmem:[%s4745_s15 + $0x38] sm:$0xff]  }
 0x752   :  { %3433 = vmatpush3.bf16.msra.mxu1 %v3586_v63  ;;  %v3605_v63 = vld [vmem:[%s4747_s17 + $0x50] ss:$8 sps:$4 sm:$0xff]  }
 0x753   :  { %3434 = vmatprep.subr.bf16.mxu1 %v3590_v1 }
 0x756   :  { %3435 = vmatpush3.bf16.msra.mxu1 %v3590_v1 }
 0x824   :  { %v3430_v7 = vpop.f32.mrb[52].mxu1 }
 0x825   :  { %v1656_v8 = vadd.f32 %v3430_v7, %v3031_v5  ;;  %v1632_v9 = vpop.f32.mrb[53].mxu1 }
 0x826   :  { %v1654_v10 = vadd.f32 %v3031_v5, %v1632_v9  ;;  %v3431_v12 = vpop.f32.mrb[54].mxu1 }
 0x827   :  { %3795 = vtanh.f32 %v1656_v8  ;;  %v1657_v13 = vadd.f32 %v3431_v12, %v3031_v5  ;;  %v1635_v15 = vpop.f32.mrb[55].mxu1 }
 0x828   :  { %3797 = vtanh.f32 %v1654_v10  ;;  %v1655_v16 = vadd.f32 %v3031_v5, %v1635_v15 }
 0x829   :  { %3799 = vtanh.f32 %v1657_v13 }
 0x82a   :  { %3801 = vtanh.f32 %v1655_v16 }
 0x831   :  { %v3796_v17 = vpop.eup %3795 }
 0x832   :  { %v3798_v18 = vpop.eup %3797 }
 0x833   :  { %v3800_v19 = vpop.eup %3799 }
 0x834   :  { %v3802_v20 = vpop.eup %3801  ;;  %v1663_v21 = vpack.c.bf16 %v3800_v19, %v3796_v17 }
 0x835   :  { %v1662_v22 = vpack.c.bf16 %v3802_v20, %v3798_v18 }
 0x837   :  { %3036 = vmatmul.mubr.msk.bf16.vlgmr.msra.gmra.mrb[36].mxu0 %vm652_vm2, %v1662_v22  ;;  %3436 = vmatprep.mubr.msk.bf16.mxu1 %vm652_vm2, %v1662_v22 }
 0x838   :  { %3437 = vmatmul.mubr.msk.bf16.vlgmr.msra.gmra.mrb[56].mxu1 %vm652_vm2, %v1663_v21  ;;  %1732 = vmatprep.mubr.bf16.mxu0 %v3899_v2 }
 0x839   :  { %1764 = vmatpush1.bf16.msra.mxu0 %v3591_v26  ;;  %3444 = vmatprep.mubr.msk.bf16.mxu1 %vm652_vm2, %v4461_v28 }
 0x83a   :  { %1765 = vmatprep.subr.bf16.mxu0 %v3596_v27 }
 0x83d   :  { %1766 = vmatpush1.bf16.msra.mxu0 %v3594_v29 }
 0x83e   :  { %3456 = vmatprep.subr.bf16.mxu0 %v3597_v11 }
 0x83f   :  { %3037 = vmatmul.mubr.msk.bf16.gmra.mrb[40].mxu0 %vm652_vm2, %v1663_v21 }
 0x840   :  { %1795 = vmatprep.mubr.bf16.mxu0 %v3899_v2 }
 0x847   :  { %3042 = vmatmul.mubr.msk.bf16.vlgmr.msra.gmra.mrb[36].mxu0 %vm652_vm2, %v4449_v25 }
 0x848   :  { %1805 = vmatprep.mubr.bf16.mxu0 %v3899_v2  ;;  %3457 = vmatpush3.bf16.msra.mxu0 %v3597_v11 }
 0x849   :  { %3458 = vmatprep.subr.bf16.mxu0 %v3598_v43 }
 0x84c   :  { %3459 = vmatpush3.bf16.msra.mxu0 %v3598_v43 }
 0x84d   :  { %3464 = vmatprep.subr.bf16.mxu0 %v3599_v44 }
 0x84f   :  { %3043 = vmatmul.mubr.msk.bf16.gmra.mrb[40].mxu0 %vm652_vm2, %v4447_v24 }
 0x90b   :  { %v3438_v30 = vpop.f32.mrb[56].mxu1 }
 0x90c   :  { %v1867_v31 = vpop.f32.mrb[57].mxu1 }
 0x90d   :  { %v3439_v45 = vpop.f32.mrb[58].mxu1 }
 0x90e   :  { %v1883_v32 = vpack.c.bf16 %v3439_v45, %v3438_v30  ;;  %v1870_v33 = vpop.f32.mrb[59].mxu1 }
 0x90f   :  { %v1882_v34 = vpack.c.bf16 %v1870_v33, %v1867_v31 }
 0x911   :  { %3440 = vmatprep.subr.bf16.mxu1 %v1882_v34 }
 0x912   :  { %3441 = vmatpush3.bf16.msra.mxu1 %v1882_v34 }
 0x913   :  { %3442 = vmatprep.subr.bf16.mxu1 %v1883_v32 }
 0x916   :  { %3443 = vmatpush3.bf16.msra.mxu1 %v1883_v32 }
 0x919   :  { %3445 = vmatmul.mubr.msk.bf16.vlgmr.msra.gmra.mrb[60].mxu1 %vm652_vm2, %v4471_v14 }
 0x91a   :  { %3452 = vmatprep.mubr.msk.bf16.mxu1 %vm652_vm2, %v4433_v53 }
 0x9ec   :  { %v3446_v25 = vpop.f32.mrb[60].mxu1 }
 0x9ed   :  { %3803 = vtanh.f32 %v3446_v25  ;;  %v1918_v37 = vpop.f32.mrb[61].mxu1 }
 0x9ee   :  { %3805 = vtanh.f32 %v1918_v37  ;;  %v3447_v24 = vpop.f32.mrb[62].mxu1 }
 0x9ef   :  { %3807 = vtanh.f32 %v3447_v24  ;;  %v1921_v38 = vpop.f32.mrb[63].mxu1  ;;  %v3611_v24 = vld [vmem:[%s4745_s15 + $0x40] sm:$0xff]  }
 0x9f0   :  { %3809 = vtanh.f32 %v1921_v38 }
 0x9f7   :  { %v3804_v39 = vpop.eup %3803 }
 0x9f8   :  { %v3806_v51 = vpop.eup %3805 }
 0x9f9   :  { %v3808_v40 = vpop.eup %3807 }
 0x9fa   :  { %v3810_v23 = vpop.eup %3809  ;;  %v1938_v58 = vpack.c.bf16 %v3808_v40, %v3804_v39 }
 0x9fb   :  { %v1937_v41 = vpack.c.bf16 %v3810_v23, %v3806_v51 }
 0x9fd   :  { %3448 = vmatprep.subr.bf16.mxu1 %v1937_v41 }
 0x9fe   :  { %3449 = vmatpush3.bf16.msra.mxu1 %v1937_v41 }
 0x9ff   :  { %3450 = vmatprep.subr.bf16.mxu1 %v1938_v58 }
 0xa02   :  { %3451 = vmatpush3.bf16.msra.mxu1 %v1938_v58 }
 0xa03   :  { %3472 = vmatprep.subr.bf16.mxu1 %v3604_v60 }
 0xa05   :  { %3453 = vmatmul.mubr.msk.bf16.vlgmr.msra.gmra.mrb[64].mxu1 %vm652_vm2, %v4431_v46 }
 0xa06   :  { %3473 = vmatpush3.bf16.msra.mxu1 %v3604_v60 }
 0xa07   :  { %3474 = vmatprep.subr.bf16.mxu1 %v3608_v62 }
 0xa0a   :  { %3475 = vmatpush3.bf16.msra.mxu1 %v3608_v62 }
 0xad8   :  { %v3454_v47 = vpop.f32.mrb[64].mxu1 }
 0xad9   :  { %3811 = vtanh.f32 %v3454_v47  ;;  %v1973_v48 = vpop.f32.mrb[65].mxu1  ;;  %v3615_v47 = vld [vmem:[%s4747_s17 + $0x64] ss:$8 sps:$4 sm:$0xff]  }
 0xada   :  { %3813 = vtanh.f32 %v1973_v48  ;;  %v3455_v49 = vpop.f32.mrb[66].mxu1  ;;  %v3613_v48 = vld [vmem:[%s4747_s17 + $0x60] ss:$8 sps:$4 sm:$0xff]  }
 0xadb   :  { %3815 = vtanh.f32 %v3455_v49  ;;  %v1976_v36 = vpop.f32.mrb[67].mxu1  ;;  %v3618_v49 = vld [vmem:[%s4747_s17 + $0x74] ss:$8 sps:$4 sm:$0xff]  }
 0xadc   :  { %3817 = vtanh.f32 %v1976_v36  ;;  %v3616_v36 = vld [vmem:[%s4747_s17 + $0x70] ss:$8 sps:$4 sm:$0xff]  }
 0xae3   :  { %v3812_v50 = vpop.eup %3811 }
 0xae4   :  { %v3814_v35 = vpop.eup %3813 }
 0xae5   :  { %v3816_v42 = vpop.eup %3815 }
 0xae6   :  { %v3818_v54 = vpop.eup %3817  ;;  %v2002_v55 = vpack.c.bf16 %v3816_v42, %v3812_v50  ;;  %v3619_v50 = vld [vmem:[%s4749_s19 + $0x40] sm:$0xff]  }
 0xae7   :  { %v2001_v56 = vpack.c.bf16 %v3818_v54, %v3814_v35  ;;  %v3109_v35 = vld [vmem:[%s4746_s16 + $0x2] ss:$0 sm:$0xff] }
 0xae9   :  { %3460 = vmatprep.mubr.msk.bf16.mxu0 %vm652_vm2, %v2001_v56 }
 0xaea   :  { %3461 = vmatmul.mubr.msk.bf16.vlgmr.msra.gmra.mrb[44].mxu0 %vm652_vm2, %v2002_v55 }
 0xaeb   :  { %3465 = vmatpush3.bf16.msra.mxu0 %v3599_v44  ;;  %3468 = vmatprep.mubr.msk.bf16.mxu0 %vm652_vm2, %v1937_v41  ;;  %v3612_v44 = vld [vmem:[%s4745_s15 + $0x48] sm:$0xff]  }
 0xaec   :  { %3466 = vmatprep.subr.bf16.mxu0 %v3600_v57 }
 0xaef   :  { %3467 = vmatpush3.bf16.msra.mxu0 %v3600_v57 }
 0xaf0   :  { %2181 = vmatprep.subr.bf16.mxu0 %v3603_v59 }
 0xaf6   :  { %3469 = vmatmul.mubr.msk.bf16.vlgmr.msra.gmra.mrb[44].mxu0 %vm652_vm2, %v1938_v58 }
 0xaf7   :  { %2213 = vmatprep.mubr.bf16.mxu0 %v3899_v2  ;;  %2182 = vmatpush1.bf16.msra.mxu0 %v3601_v52 }
 0xaf8   :  { %2183 = vmatprep.subr.bf16.mxu0 %v3607_v61 }
 0xafb   :  { %2184 = vmatpush1.bf16.msra.mxu0 %v3605_v63 }
 0xafc   :  { %2607 = vmatprep.subr.bf16.mxu0 %v3615_v47 }
 0xbc9   :  { %v3470_v1 = vpop.f32.mrb[44].mxu0 }
 0xbca   :  { %v2147_v3 = vadd.f32 %v3470_v1, %v3073_v0  ;;  %v2122_v4 = vpop.f32.mrb[45].mxu0 }
 0xbcb   :  { %v2145_v5 = vadd.f32 %v3073_v0, %v2122_v4  ;;  %v3471_v7 = vpop.f32.mrb[46].mxu0 }
 0xbcc   :  { %3819 = vtanh.f32 %v2147_v3  ;;  %v2148_v8 = vadd.f32 %v3471_v7, %v3073_v0  ;;  %v2125_v9 = vpop.f32.mrb[47].mxu0  ;;  %v3620_v3 = vld [vmem:[%s4749_s19] sm:$0xff]   ;;  %v3622_v7 = vld [vmem:[%s4749_s19 + $0x8] sm:$0xff]  }
 0xbcd   :  { %3821 = vtanh.f32 %v2145_v5  ;;  %v2146_v10 = vadd.f32 %v3073_v0, %v2125_v9  ;;  %v3621_v5 = vld [vmem:[%s4749_s19 + $0x48] sm:$0xff]   ;;  %v3624_v9 = vld [vmem:[%s4749_s19 + $0x10] sm:$0xff]  }
 0xbce   :  { %3823 = vtanh.f32 %v2148_v8  ;;  %v3623_v8 = vld [vmem:[%s4749_s19 + $0x50] sm:$0xff]  }
 0xbcf   :  { %3825 = vtanh.f32 %v2146_v10  ;;  %v3626_v10 = vld [vmem:[%s4749_s19 + $0x18] sm:$0xff]  }
 0xbd6   :  { %v3820_v12 = vpop.eup %3819 }
 0xbd7   :  { %v3822_v13 = vpop.eup %3821 }
 0xbd8   :  { %v3824_v15 = vpop.eup %3823 }
 0xbd9   :  { %v3826_v16 = vpop.eup %3825  ;;  %v2154_v17 = vpack.c.bf16 %v3824_v15, %v3820_v12  ;;  %v3627_v12 = vld [vmem:[%s4749_s19 + $0x60] sm:$0xff]   ;;  %v3629_v15 = vld [vmem:[%s4749_s19 + $0x68] sm:$0xff]  }
 0xbda   :  { %v2153_v18 = vpack.c.bf16 %v3826_v16, %v3822_v13  ;;  %v3628_v13 = vld [vmem:[%s4749_s19 + $0x20] sm:$0xff]   ;;  %v3630_v16 = vld [vmem:[%s4749_s19 + $0x28] sm:$0xff]  }
 0xbdc   :  { %3078 = vmatmul.mubr.msk.bf16.vlgmr.msra.gmra.mrb[36].mxu0 %vm652_vm2, %v2153_v18  ;;  %3476 = vmatprep.mubr.msk.bf16.mxu1 %vm652_vm2, %v2153_v18  ;;  %v3632_v18 = vld [vmem:[%s4749_s19 + $0x30] sm:$0xff]  }
 0xbdd   :  { %3477 = vmatmul.mubr.msk.bf16.vlgmr.msra.gmra.mrb[68].mxu1 %vm652_vm2, %v2154_v17  ;;  %2223 = vmatprep.mubr.bf16.mxu0 %v3899_v2 }
 0xbde   :  { %3484 = vmatprep.mubr.msk.bf16.mxu1 %vm652_vm2, %v4461_v28  ;;  %2608 = vmatpush1.bf16.msra.mxu0 %v3613_v48 }
 0xbdf   :  { %2609 = vmatprep.subr.bf16.mxu0 %v3618_v49 }
 0xbe2   :  { %2610 = vmatpush1.bf16.msra.mxu0 %v3616_v36 }
 0xbe3   :  { %3250 = vmatprep.subr.bf16.mxu0 %v3619_v50 }
 0xbe4   :  { %3079 = vmatmul.mubr.msk.bf16.gmra.mrb[40].mxu0 %vm652_vm2, %v2154_v17  ;;  %v3631_v17 = vld [vmem:[%s4749_s19 + $0x70] sm:$0xff]  }
 0xbe5   :  { %2639 = vmatprep.mubr.bf16.mxu0 %v3899_v2 }
 0xcb0   :  { %v3478_v19 = vpop.f32.mrb[68].mxu1 }
 0xcb1   :  { %v2293_v20 = vpop.f32.mrb[69].mxu1 }
 0xcb2   :  { %v3479_v21 = vpop.f32.mrb[70].mxu1 }
 0xcb3   :  { %v2309_v22 = vpack.c.bf16 %v3479_v21, %v3478_v19  ;;  %v2296_v26 = vpop.f32.mrb[71].mxu1  ;;  %v3633_v19 = vld [vmem:[%s4749_s19 + $0x78] sm:$0xff]   ;;  %v2672_v21 = vsub.s32 0, %v4309_v6 }
 0xcb4   :  { %v2308_v27 = vpack.c.bf16 %v2296_v26, %v2293_v20  ;;  %v3634_v20 = vld [vmem:[%s4749_s19 + $0x38] sm:$0xff]   ;;  %v2676_v26 = vsub.s32 1, %v4309_v6 }
 0xcb6   :  { %3480 = vmatprep.subr.bf16.mxu1 %v2308_v27 }
 0xcb7   :  { %3481 = vmatpush3.bf16.msra.mxu1 %v2308_v27 }
 0xcb8   :  { %3482 = vmatprep.subr.bf16.mxu1 %v2309_v22 }
 0xcbb   :  { %3483 = vmatpush3.bf16.msra.mxu1 %v2309_v22  ;;  %v2668_v22 = vld [vmem:[%s4748_s18] sm:$0x3] }
 0xcbc   :  { %v2673_v27 = vrot.slane %v2668_v22, %v2672_v21  ;;  %v2885_v21 = vld [vmem:[%s4768_s7 + $0x8] sm:$0xff] }
 0xcbe   :  { %3485 = vmatmul.mubr.msk.bf16.vlgmr.msra.gmra.mrb[72].mxu1 %vm652_vm2, %v4471_v14  ;;  %v3610_v14 = vld [vmem:[%s4745_s15 + $0x58] sm:$0xff]  }
 0xcbf   :  { %3492 = vmatprep.mubr.msk.bf16.mxu1 %vm652_vm2, %v4433_v53  ;;  %v3609_v53 = vld [vmem:[%s4745_s15 + $0x50] sm:$0xff]  }
 0xd91   :  { %v3486_v28 = vpop.f32.mrb[72].mxu1 }
 0xd92   :  { %3827 = vtanh.f32 %v3486_v28  ;;  %v2344_v29 = vpop.f32.mrb[73].mxu1  ;;  %v2677_v28 = vrot.slane %v2668_v22, %v2676_v26 }
 0xd93   :  { %3829 = vtanh.f32 %v2344_v29  ;;  %v3487_v30 = vpop.f32.mrb[74].mxu1 }
 0xd94   :  { %3831 = vtanh.f32 %v3487_v30  ;;  %v2347_v31 = vpop.f32.mrb[75].mxu1 }
 0xd95   :  { %3833 = vtanh.f32 %v2347_v31 }
 0xd9c   :  { %v3828_v45 = vpop.eup %3827 }
 0xd9d   :  { %v3830_v32 = vpop.eup %3829 }
 0xd9e   :  { %v3832_v33 = vpop.eup %3831 }
 0xd9f   :  { %v3834_v34 = vpop.eup %3833  ;;  %v2364_v25 = vpack.c.bf16 %v3832_v33, %v3828_v45 }
 0xda0   :  { %v2363_v37 = vpack.c.bf16 %v3834_v34, %v3830_v32 }
 0xda2   :  { %3488 = vmatprep.subr.bf16.mxu1 %v2363_v37 }
 0xda3   :  { %3489 = vmatpush3.bf16.msra.mxu1 %v2363_v37 }
 0xda4   :  { %3490 = vmatprep.subr.bf16.mxu1 %v2364_v25 }
 0xda7   :  { %3491 = vmatpush3.bf16.msra.mxu1 %v2364_v25 }
 0xda8   :  { %3496 = vmatprep.subr.bf16.mxu1 %v3609_v53 }
 0xdaa   :  { %3493 = vmatmul.mubr.msk.bf16.vlgmr.msra.gmra.mrb[76].mxu1 %vm652_vm2, %v4431_v46 }
 0xdab   :  { %3497 = vmatpush3.bf16.msra.mxu1 %v3609_v53 }
 0xdac   :  { %3498 = vmatprep.subr.bf16.mxu1 %v3610_v14 }
 0xdaf   :  { %3499 = vmatpush3.bf16.msra.mxu1 %v3610_v14 }
 0xdb0   :  { %3504 = vmatprep.subr.bf16.mxu1 %v3611_v24 }
 0xe7d   :  { %v3494_v38 = vpop.f32.mrb[76].mxu1 }
 0xe7e   :  { %3835 = vtanh.f32 %v3494_v38  ;;  %v2399_v46 = vpop.f32.mrb[77].mxu1 }
 0xe7f   :  { %3837 = vtanh.f32 %v2399_v46  ;;  %v3495_v39 = vpop.f32.mrb[78].mxu1 }
 0xe80   :  { %3839 = vtanh.f32 %v3495_v39  ;;  %v2402_v51 = vpop.f32.mrb[79].mxu1 }
 0xe81   :  { %3841 = vtanh.f32 %v2402_v51 }
 0xe88   :  { %v3836_v40 = vpop.eup %3835 }
 0xe89   :  { %v3838_v23 = vpop.eup %3837 }
 0xe8a   :  { %v3840_v58 = vpop.eup %3839 }
 0xe8b   :  { %v3842_v41 = vpop.eup %3841  ;;  %v2428_v11 = vpack.c.bf16 %v3840_v58, %v3836_v40 }
 0xe8c   :  { %v2427_v43 = vpack.c.bf16 %v3842_v41, %v3838_v23 }
 0xe8e   :  { %3500 = vmatprep.mubr.msk.bf16.mxu1 %vm652_vm2, %v2427_v43 }
 0xe8f   :  { %3501 = vmatmul.mubr.msk.bf16.vlgmr.msra.gmra.mrb[80].mxu1 %vm652_vm2, %v2428_v11 }
 0xe90   :  { %3505 = vmatpush3.bf16.msra.mxu1 %v3611_v24  ;;  %3508 = vmatprep.mubr.msk.bf16.mxu1 %vm652_vm2, %v2363_v37 }
 0xe91   :  { %3506 = vmatprep.subr.bf16.mxu1 %v3612_v44 }
 0xe94   :  { %3507 = vmatpush3.bf16.msra.mxu1 %v3612_v44 }
 0xe9b   :  { %3509 = vmatmul.mubr.msk.bf16.vlgmr.msra.gmra.mrb[80].mxu1 %vm652_vm2, %v2364_v25 }
 0xf6e   :  { %v3510_v42 = vpop.f32.mrb[80].mxu1 }
 0xf6f   :  { %v2573_v54 = vadd.f32 %v3510_v42, %v3109_v35  ;;  %v2548_v55 = vpop.f32.mrb[81].mxu1 }
 0xf70   :  { %v2571_v56 = vadd.f32 %v3109_v35, %v2548_v55  ;;  %v3511_v57 = vpop.f32.mrb[82].mxu1 }
 0xf71   :  { %3843 = vtanh.f32 %v2573_v54  ;;  %v2574_v52 = vadd.f32 %v3511_v57, %v3109_v35  ;;  %v2551_v59 = vpop.f32.mrb[83].mxu1 }
 0xf72   :  { %3845 = vtanh.f32 %v2571_v56  ;;  %v2572_v60 = vadd.f32 %v3109_v35, %v2551_v59  ;;  %v3116_v35 = vld [vmem:[%s4750_s20] ss:$0 sm:$0xff]  ;;  %s3900_s20 = smov 96  }
 0xf73   :  { %3847 = vtanh.f32 %v2574_v52 }
 0xf74   :  { %3849 = vtanh.f32 %v2572_v60 }
 0xf7b   :  { %v3844_v61 = vpop.eup %3843 }
 0xf7c   :  { %v3846_v62 = vpop.eup %3845 }
 0xf7d   :  { %v3848_v63 = vpop.eup %3847 }
 0xf7e   :  { %v3850_v0 = vpop.eup %3849  ;;  %v2580_v1 = vpack.c.bf16 %v3848_v63, %v3844_v61 }
 0xf7f   :  { %v2579_v4 = vpack.c.bf16 %v3850_v0, %v3846_v62 }
 0xf81   :  { %3114 = vmatmul.mubr.msk.bf16.vlgmr.msra.gmra.mrb[36].mxu0 %vm652_vm2, %v2579_v4 }
 0xf82   :  { %2649 = vmatprep.mubr.bf16.mxu0 %v3899_v2  ;;  %3251 = vmatpush3.bf16.msra.mxu0 %v3620_v3  ;;  %v3625_v2 = vld [vmem:[%s4749_s19 + $0x58] sm:$0xff]  }
 0xf83   :  { %3252 = vmatprep.subr.bf16.mxu0 %v3621_v5 }
 0xf86   :  { %3253 = vmatpush3.bf16.msra.mxu0 %v3622_v7 }
 0xf87   :  { %3254 = vmatprep.subr.bf16.mxu0 %v3623_v8 }
 0xf89   :  { %3115 = vmatmul.mubr.msk.bf16.gmra.mrb[40].mxu0 %vm652_vm2, %v2580_v1 }
 0xf8a   :  { %3255 = vmatpush3.bf16.msra.mxu0 %v3624_v9 }
 0xf8b   :  { %3256 = vmatprep.subr.bf16.mxu0 %v3625_v2 }
 0xf8e   :  { %3257 = vmatpush3.bf16.msra.mxu0 %v3626_v10 }
 0xf8f   :  { %3258 = vmatprep.subr.bf16.mxu0 %v3627_v12 }
 0xf92   :  { %3259 = vmatpush3.bf16.msra.mxu0 %v3628_v13 }
 0xf93   :  { %3260 = vmatprep.subr.bf16.mxu0 %v3629_v15 }
 0xf96   :  { %3261 = vmatpush3.bf16.msra.mxu0 %v3630_v16 }
 0xf97   :  { %3262 = vmatprep.subr.bf16.mxu0 %v3631_v17 }
 0xf9a   :  { %3263 = vmatpush3.bf16.msra.mxu0 %v3632_v18 }
 0xf9b   :  { %3264 = vmatprep.subr.bf16.mxu0 %v3633_v19  ;;  %v2884_v19 = vld [vmem:[%s4768_s7] sm:$0xff] }
 0xf9e   :  { %3265 = vmatpush3.bf16.msra.mxu0 %v3634_v20 }
0x1054   :  { %v2641_v29 = vpop.f32.mrb[36].mxu0 }
0x1055   :  { %v2680_v30 = vadd.f32 %v2673_v27, %v2641_v29  ;;  %v2643_v31 = vpop.f32.mrb[37].mxu0 }
0x1056   :  { %v2681_v45 = vadd.f32 %v2677_v28, %v2643_v31  ;;  %v2645_v32 = vpop.f32.mrb[38].mxu0  ;;  %v2886_v31 = vld [vmem:[%s4768_s7 + $0x10] sm:$0xff] }
0x1057   :  { %3851 = vtanh.f32 %v2680_v30  ;;  %v2682_v33 = vadd.f32 %v2673_v27, %v2645_v32  ;;  %v2647_v34 = vpop.f32.mrb[39].mxu0 }
0x1058   :  { %3853 = vtanh.f32 %v2681_v45  ;;  %v2683_v25 = vadd.f32 %v2677_v28, %v2647_v34  ;;  %v3902_v45 = vmov 0.0   ;;  %v2887_v34 = vld [vmem:[%s4768_s7 + $0x18] sm:$0xff] }
0x1059   :  { %3855 = vtanh.f32 %v2682_v33 }
0x105a   :  { %3857 = vtanh.f32 %v2683_v25 }
0x105c   :  { %v2651_v37 = vpop.f32.mrb[40].mxu0 }
0x105d   :  { %v2684_v53 = vadd.f32 %v2673_v27, %v2651_v37  ;;  %v2653_v14 = vpop.f32.mrb[41].mxu0 }
0x105e   :  { %v2685_v24 = vadd.f32 %v2677_v28, %v2653_v14  ;;  %v2655_v38 = vpop.f32.mrb[42].mxu0 }
0x105f   :  { %3859 = vtanh.f32 %v2684_v53  ;;  %v2686_v6 = vadd.f32 %v2673_v27, %v2655_v38  ;;  %v2657_v46 = vpop.f32.mrb[43].mxu0 }
0x1060   :  { %3861 = vtanh.f32 %v2685_v24  ;;  %v2687_v39 = vadd.f32 %v2677_v28, %v2657_v46 }
0x1061   :  { %v3852_v51 = vpop.eup %3851  ;;  %3863 = vtanh.f32 %v2686_v6 }
0x1062   :  { %v3854_v40 = vpop.eup %3853  ;;  %3865 = vtanh.f32 %v2687_v39 }
0x1063   :  { %v3856_v23 = vpop.eup %3855 }
0x1064   :  { %v3858_v58 = vpop.eup %3857  ;;  %v2728_v41 = vpack.c.bf16 %v3856_v23, %v3852_v51 }
0x1065   :  { %v2729_v11 = vpack.c.bf16 %v3858_v58, %v3854_v40 }
0x1067   :  { %2867 = vmatprep.mubr.bf16.mxu0 %v2729_v11 }
0x1068   :  { %2868 = vmatmul.mubr.bf16.vlgmr.msra.gmra.mrb[48].mxu0 %v2728_v41 }
0x1069   :  { %v3860_v43 = vpop.eup %3859 }
0x106a   :  { %v3862_v44 = vpop.eup %3861 }
0x106b   :  { %v3864_v47 = vpop.eup %3863 }
0x106c   :  { %v3866_v48 = vpop.eup %3865  ;;  %v2730_v49 = vpack.c.bf16 %v3864_v47, %v3860_v43 }
0x106d   :  { %v2731_v36 = vpack.c.bf16 %v3866_v48, %v3862_v44 }
0x106f   :  { %2875 = vmatprep.mubr.bf16.mxu0 %v2731_v36 }
0x1070   :  { %2876 = vmatmul.mubr.bf16.gmra.mrb[52].mxu0 %v2730_v49 }
0x113b   :  { %v3266_v50 = vpop.f32.mrb[48].mxu0 }
0x113c   :  { %v3267_v42 = vpop.f32.mrb[49].mxu0 }
0x113d   :  { %v3268_v54 = vadd.f32 %v3267_v42, %v3266_v50  ;;  %v3269_v55 = vpop.f32.mrb[50].mxu0 }
0x113e   :  { %v3270_v56 = vpop.f32.mrb[51].mxu0 }
0x113f   :  { %v2870_v57 = vadd.f32 %v3268_v54, %v3116_v35  ;;  %v3271_v52 = vadd.f32 %v3270_v56, %v3269_v55 }
0x1141   :  { %v2888_v59 = vmul.f32 0.5, %v2870_v57  ;;  %v2873_v60 = vadd.f32 %v3271_v52, %v3116_v35 }
0x1143   :  { %v2892_v61 = vmul.f32 1.442695, %v2888_v59  ;;  %v2889_v62 = vmul.f32 0.5, %v2873_v60  ;;  %v3272_v63 = vpop.f32.mrb[52].mxu0 }
0x1144   :  { %v3273_v0 = vpop.f32.mrb[53].mxu0 }
0x1145   :  { %3867 = vpow2.f32 %v2892_v61  ;;  %v2894_v1 = vmul.f32 1.442695, %v2889_v62  ;;  %v3274_v3 = vadd.f32 %v3273_v0, %v3272_v63  ;;  %v3275_v4 = vpop.f32.mrb[54].mxu0 }
0x1146   :  { %v3276_v5 = vpop.f32.mrb[55].mxu0 }
0x1147   :  { %3869 = vpow2.f32 %v2894_v1  ;;  %v2878_v7 = vadd.f32 %v3274_v3, %v3116_v35  ;;  %v3277_v8 = vadd.f32 %v3276_v5, %v3275_v4 }
0x1149   :  { %v2890_v9 = vmul.f32 0.5, %v2878_v7  ;;  %v2881_v2 = vadd.f32 %v3277_v8, %v3116_v35 }
0x114b   :  { %v2896_v10 = vmul.f32 1.442695, %v2890_v9  ;;  %v2891_v12 = vmul.f32 0.5, %v2881_v2 }
0x114d   :  { %3871 = vpow2.f32 %v2896_v10  ;;  %v2898_v13 = vmul.f32 1.442695, %v2891_v12 }
0x114f   :  { %v3868_v15 = vpop.eup %3867  ;;  %3873 = vpow2.f32 %v2898_v13 }
0x1150   :  { %2904 = vrot.lane.b32.xlu0 %v3868_v15, %s3900_s20 }
0x1151   :  { %v3870_v16 = vpop.eup %3869 }
0x1152   :  { %2906 = vrot.lane.b32.xlu1 %v3870_v16, %s3900_s20 }
0x1154   :  { %2932 = vrot.lane.b32.xlu0 %v2870_v57, %s3901_s4 }
0x1157   :  { %v3872_v17 = vpop.eup %3871 }
0x1158   :  { %2936 = vrot.lane.b32.xlu0 %v2878_v7, %s3901_s4  ;;  %2908 = vrot.lane.b32.xlu1 %v3872_v17, %s3900_s20 }
0x1159   :  { %v3874_v18 = vpop.eup %3873 }
0x115c   :  { %2910 = vrot.lane.b32.xlu1 %v3874_v18, %s3900_s20 }
0x1160   :  { %2934 = vrot.lane.b32.xlu1 %v2873_v60, %s3901_s4 }
0x1164   :  { %2938 = vrot.lane.b32.xlu1 %v2881_v2, %s3901_s4 }
0x11c2   :  { %v2905_v20 = vpop.permute.xlu0 %2904 }
0x11c3   :  { %v2916_v22 = vmul.f32 %v2905_v20, %v2884_v19 }
0x11c4   :  { %v2907_v26 = vpop.permute.xlu1 %2906 }
0x11c5   :  { %v2920_v27 = vadd.f32 %v2916_v22, %v2870_v57  ;;  %v2917_v28 = vmul.f32 %v2907_v26, %v2885_v21 }
0x11c6   :  { %v2933_v29 = vpop.permute.xlu0 %2932 }
0x11c7   :  { %2924 = vst.msk [vmem:[#allocation2] sm:$0xff] %vm652_vm2, %v2920_v27  ;;  %v2921_v30 = vadd.f32 %v2917_v28, %v2873_v60 }
0x11c8   :  { %2945 = vst.msk [vmem:[#allocation2] sm:$0xff] %vm2944_vm12, %v2933_v29 }
0x11c9   :  { %2925 = vst.msk [vmem:[#allocation2 + $0x8] sm:$0xff] %vm652_vm2, %v2921_v30 }
0x11ca   :  { %2950 = vst.msk [vmem:[#allocation2] sm:$0xff] %vm2949_vm13, %v2933_v29  ;;  %v2909_v32 = vpop.permute.xlu1 %2908  ;;  %v2937_v53 = vpop.permute.xlu0 %2936 }
0x11cb   :  { %2955 = vst.msk [vmem:[#allocation2] sm:$0xff] %vm2954_vm14, %v3902_v45  ;;  %v2918_v33 = vmul.f32 %v2909_v32, %v2886_v31 }
0x11cd   :  { %v2922_v25 = vadd.f32 %v2918_v33, %v2878_v7 }
0x11ce   :  { %v2911_v37 = vpop.permute.xlu1 %2910 }
0x11cf   :  { %2926 = vst.msk [vmem:[#allocation2 + $0x10] sm:$0xff] %vm652_vm2, %v2922_v25  ;;  %v2919_v14 = vmul.f32 %v2911_v37, %v2887_v34 }
0x11d0   :  { %2947 = vst.msk [vmem:[#allocation2 + $0x10] sm:$0xff] %vm2944_vm12, %v2937_v53 }
0x11d1   :  { %2952 = vst.msk [vmem:[#allocation2 + $0x10] sm:$0xff] %vm2949_vm13, %v2937_v53  ;;  %v2923_v24 = vadd.f32 %v2919_v14, %v2881_v2 }
0x11d2   :  { %2957 = vst.msk [vmem:[#allocation2 + $0x10] sm:$0xff] %vm2954_vm14, %v3902_v45  ;;  %v2935_v38 = vpop.permute.xlu1 %2934 }
0x11d3   :  { %2927 = vst.msk [vmem:[#allocation2 + $0x18] sm:$0xff] %vm652_vm2, %v2923_v24 }
0x11d4   :  { %2946 = vst.msk [vmem:[#allocation2 + $0x8] sm:$0xff] %vm2944_vm12, %v2935_v38 }
0x11d5   :  { %2951 = vst.msk [vmem:[#allocation2 + $0x8] sm:$0xff] %vm2949_vm13, %v2935_v38 }
0x11d6   :  { %2956 = vst.msk [vmem:[#allocation2 + $0x8] sm:$0xff] %vm2954_vm14, %v3902_v45  ;;  %v2939_v6 = vpop.permute.xlu1 %2938 }
0x11d7   :  { %2948 = vst.msk [vmem:[#allocation2 + $0x18] sm:$0xff] %vm2944_vm12, %v2939_v6 }
0x11d8   :  { %2953 = vst.msk [vmem:[#allocation2 + $0x18] sm:$0xff] %vm2949_vm13, %v2939_v6 }
0x11d9   :  { %2958 = vst.msk [vmem:[#allocation2 + $0x18] sm:$0xff] %vm2954_vm14, %v3902_v45 }
0x11da   :  { %3886 = shalt.err (!%p3883_p4)
}
0x11db   :  { %s3887_s24 = scalar_lea.hbm %s4751_s21, 512 }
0x11dc   :  { %p3888_p5 = scmp.ne.s32.totalorder %s4751_s21, %s3887_s24  ;;  %p3891_p6 = scmp.lt.u32.totalorder %s3887_s24, %s4751_s21 }
0x11de   :  { %p3893_p7 = pnand %p3891_p6, %p3888_p5 }
0x11e0   :  { %3896 = shalt.err (!%p3893_p7)
}
0x11e1   :  { %s3904_s26 = smov 128   ;;  %s3905_s27 = smov 8  }
0x11e2   :  { %2970 = dma.vmem_to_hbm [thread:$0]  %s2965_s13, 512, %s4751_s21, [#allocation3], %s3904_s26, %s3904_s26, %s3905_s27  }
0x11e3   :  { %3897 = dma.done.wait [#allocation3], 512  }
0x11e4   :  { %3898 = vsyncadd [#allocation3], 4294966784 }
0x11e5   :  { %2974 = vsyncpa [#allocation3], 1 }

</bundles_post_ra>
